<compile_context>
chip_gen: v5e
topology: v5e:2x2
jax: 0.10.0
libtpu: 0.0.40
codegen_flags: <defaults>
</compile_context>

<pallas_src>
import functools
import math

import jax
import jax.numpy as jnp
import numpy as np
from jax.experimental import pallas as pl
from jax.experimental.pallas import tpu as pltpu

EPS = 1e-6
_NEG_INF = -1e30


def _layernorm(x, g, b, eps=EPS):
    # Two-pass LayerNorm (closer to torch.nn.LayerNorm numerics than the
    # one-pass E[x^2]-E[x]^2 form).
    mu = jnp.mean(x, axis=-1, keepdims=True)
    xc = x - mu
    var = jnp.mean(xc * xc, axis=-1, keepdims=True)
    return xc * jax.lax.rsqrt(var + eps) * g + b


# ---------------------------------------------------------------------------
# Fused head kernel.  Grid = (batch_blocks, 3 branches, token_chunks).
# ---------------------------------------------------------------------------
def _head_kernel(x15_ref, x25_ref, x27_ref, mq_ref,
                 lng_ref, lnb_ref, kng_ref, knb_ref,
                 wkv_ref, bkv_ref, wo_ref, bo_ref,
                 fg_ref, fb_ref, fw_ref, fbias_ref,
                 out_ref,
                 m_ref, l_ref, att_ref, branch_ref,
                 *, dim, eps):
    s = pl.program_id(1)            # branch 0..2   ("arbitrary")
    t = pl.program_id(2)            # token chunk   ("arbitrary", innermost)
    nc = pl.num_programs(2)
    D = dim

    # Select this branch's token chunk.  Inactive branches' windows are pinned
    # to chunk 0 by their index maps (no HBM re-fetch across t); the selects
    # below are VMEM->vreg loads + VPU selects only.
    x = jnp.where(s == 0, x15_ref[...],
                  jnp.where(s == 1, x25_ref[...], x27_ref[...]))    # (TB,TN,D) bf16
    TB, TN, _ = x.shape

    @pl.when(t == 0)
    def _():   # new branch -> reset the online-softmax state
        m_ref[...] = jnp.full(m_ref.shape, _NEG_INF, m_ref.dtype)
        l_ref[...] = jnp.zeros(l_ref.shape, l_ref.dtype)
        att_ref[...] = jnp.zeros(att_ref.shape, att_ref.dtype)

    # LayerNorm(x) in f32, then fused k|v projection as ONE bf16 MXU matmul.
    x2 = x.reshape(TB * TN, D).astype(jnp.float32)
    xn = _layernorm(x2, lng_ref[0], lnb_ref[0], eps).astype(jnp.bfloat16)
    kv = jnp.dot(xn, wkv_ref[0], preferred_element_type=jnp.float32) + bkv_ref[0]
    k = _layernorm(kv[:, :D], kng_ref[0], knb_ref[0], eps)           # (TB*TN, D) f32
    v = kv[:, D:].reshape(TB, TN, D)                                  # (TB, TN, D) f32

    # Scores replicated across each head's lanes: mq[d, d'] = q[d]*scale if
    # head(d) == head(d') else 0 (built in the wrapper, bf16).  sc[.., d'] is
    # the score of head(d') broadcast over its hd lanes, so softmax and value
    # weighting stay lane-D-dense (no selector matmuls / head reshapes).
    sc = jnp.dot(k.astype(jnp.bfloat16), mq_ref[0],
                 preferred_element_type=jnp.float32).reshape(TB, TN, D)

    # Online softmax over the (chunked) token axis.
    m_prev = m_ref[...]                                   # (TB, D)
    m_new = jnp.maximum(m_prev, jnp.max(sc, axis=1))
    alpha = jnp.exp(m_prev - m_new)                       # (TB, D)
    p = jnp.exp(sc - m_new[:, None, :])                   # (TB, TN, D)
    l_ref[...] = alpha * l_ref[...] + jnp.sum(p, axis=1)
    att_ref[...] = alpha * att_ref[...] + jnp.sum(p * v, axis=1)
    m_ref[...] = m_new

    # Per-branch finalize: normalize, o_proj, stash in the branch accumulator.
    @pl.when(t == nc - 1)
    def _():
        attn = att_ref[...] / l_ref[...]     # exact reciprocal, once per branch
        o = jnp.dot(attn.astype(jnp.bfloat16), wo_ref[0],
                    preferred_element_type=jnp.float32) + bo_ref[0]   # (TB, D)
        branch_ref[s] = o

    # Epilogue (last branch, last chunk): LayerNorm(3D) + Linear(3D, 1).
    @pl.when((s == pl.num_programs(1) - 1) & (t == nc - 1))
    def _():
        cat = branch_ref[...]                              # (3, TB, D)
        n3d = 3.0 * D
        mu = jnp.sum(jnp.sum(cat, axis=0, keepdims=True),
                     axis=2, keepdims=True) / n3d          # (1, TB, 1)
        cen = cat - mu
        var = jnp.sum(jnp.sum(cen * cen, axis=0, keepdims=True),
                      axis=2, keepdims=True) / n3d
        cat_n = cen * jax.lax.rsqrt(var + eps) * fg_ref[...] + fb_ref[...]
        # final Linear(3D, 1) as VPU multiply + reductions (no 1-column matmul)
        logit = jnp.sum(jnp.sum(cat_n * fw_ref[...], axis=0),
                        axis=-1, keepdims=True)            # (TB, 1)
        out_ref[...] = logit + fbias_ref[...]


def _feat_spec(branch, tb, tn, d):
    def idx(bb, s, t):
        # Active branch streams chunk t; inactive branches stay pinned at
        # chunk 0 so Pallas elides their copies (same block index => no DMA).
        return (bb, jnp.where(s == branch, t, 0), 0)
    return pl.BlockSpec((tb, tn, d), idx)


def _vmem_limit_bytes():
    # Per-generation limit: ~85% of physical VMEM, capped at 110 MiB
    # (v5e/v6e: 128 MiB -> ~109 MiB; v7x: 64 MiB -> ~54 MiB).
    try:
        cap = getattr(pltpu.get_tpu_info(), "vmem_capacity_bytes",
                      128 * 1024 * 1024)
    except Exception:
        cap = 128 * 1024 * 1024
    return int(min(cap * 0.85, 110 * 1024 * 1024))


def apt_discriminator_head(feat15, feat25, feat27, params, num_heads,
                           *, eps=EPS, block_b=None, block_n=None):
    B, N, D = feat15.shape
    H = num_heads
    assert D % H == 0
    hd = D // H
    TB = B if block_b is None else block_b
    TN = N if block_n is None else block_n
    assert B % TB == 0 and N % TN == 0
    nb, nc = B // TB, N // TN

    branches = [params["ca15"], params["ca25"], params["ca27"]]

    # Stream features in bf16 (production contract: backbone hooks emit bf16).
    to_bf16 = lambda a: a if a.dtype == jnp.bfloat16 else a.astype(jnp.bfloat16)
    x15, x25, x27 = to_bf16(feat15), to_bf16(feat25), to_bf16(feat27)

    # Hoist the batch-invariant query path q = LN(q_proj(query_token)) and fold
    # q, the 1/sqrt(hd) scale and the per-head block-diagonal selector into a
    # single (D, D) bf16 matrix per branch.
    scale = 1.0 / math.sqrt(hd)
    head_id = jnp.arange(D, dtype=jnp.int32) // hd
    sel = (head_id[:, None] == head_id[None, :]).astype(jnp.float32)   # (D, D)

    def qmat(p):
        q = _layernorm(p["qtok"] @ p["wq"] + p["bq"], p["qn_g"], p["qn_b"], eps)
        return (q.reshape(D, 1) * scale) * sel                         # (D, D)

    mq_s = jnp.stack([qmat(p) for p in branches], 0).astype(jnp.bfloat16)  # (3,D,D)

    stack = lambda name: jnp.stack([p[name] for p in branches], axis=0)
    wkv_s = jnp.concatenate([stack("wk"), stack("wv")], axis=-1).astype(jnp.bfloat16)
    bkv_s = jnp.concatenate([stack("bk"), stack("bv")], axis=-1)       # (3, 1, 2D)
    wo_s = stack("wo").astype(jnp.bfloat16)
    bo_s = stack("bo")
    lng_s, lnb_s = stack("ln_g"), stack("ln_b")
    kng_s, knb_s = stack("kn_g"), stack("kn_b")

    fp = params["final"]
    fg = fp["g"].reshape(3, 1, D)      # LN(3D) params laid out per-branch
    fb = fp["b"].reshape(3, 1, D)
    fw = fp["w"].reshape(3, 1, D)      # (3D, 1) weight as per-branch rows
    fbias = fp["bias"]                 # (1, 1)

    br_vec = lambda width=D: pl.BlockSpec((1, 1, width), lambda bb, s, t: (s, 0, 0))
    br_mat = lambda width=D: pl.BlockSpec((1, D, width), lambda bb, s, t: (s, 0, 0))
    fin_vec = lambda: pl.BlockSpec((3, 1, D), lambda bb, s, t: (0, 0, 0))

    return pl.pallas_call(
        functools.partial(_head_kernel, dim=D, eps=eps),
        out_shape=jax.ShapeDtypeStruct((B, 1), jnp.float32),
        grid=(nb, 3, nc),
        in_specs=[
            _feat_spec(0, TB, TN, D),          # feat_15
            _feat_spec(1, TB, TN, D),          # feat_25
            _feat_spec(2, TB, TN, D),          # feat_27
            br_mat(D),                         # mq (q * scale * head selector)
            br_vec(), br_vec(),                # ln_g, ln_b
            br_vec(), br_vec(),                # kn_g, kn_b
            br_mat(2 * D), br_vec(2 * D),      # wkv, bkv (fused k|v)
            br_mat(D), br_vec(),               # wo, bo
            fin_vec(), fin_vec(), fin_vec(),   # final g, b, w
            pl.BlockSpec((1, 1), lambda bb, s, t: (0, 0)),   # final bias
        ],
        out_specs=pl.BlockSpec((TB, 1), lambda bb, s, t: (bb, 0)),
        scratch_shapes=[
            pltpu.VMEM((TB, D), jnp.float32),      # m  (running max, per-head replicated)
            pltpu.VMEM((TB, D), jnp.float32),      # l  (running softmax denom)
            pltpu.VMEM((TB, D), jnp.float32),      # att (running weighted sum)
            pltpu.VMEM((3, TB, D), jnp.float32),   # per-branch o_proj outputs
        ],
        compiler_params=pltpu.CompilerParams(
            dimension_semantics=("parallel", "arbitrary", "arbitrary"),
            vmem_limit_bytes=_vmem_limit_bytes(),
        ),
    )(x15, x25, x27, mq_s, lng_s, lnb_s, kng_s, knb_s,
      wkv_s, bkv_s, wo_s, bo_s, fg, fb, fw, fbias)


# ---------------------------------------------------------------------------
# Deterministic synthetic parameter init (shapes from the module __init__).
# Linear weights stored pre-transposed as (in, out) so kernels do x @ W + b.
# ---------------------------------------------------------------------------
def init_cross_attn_params(key, dim):
    ks = jax.random.split(key, 5)
    s = 1.0 / math.sqrt(dim)

    def lin(k):
        kw, kb = jax.random.split(k)
        w = jax.random.uniform(kw, (dim, dim), jnp.float32, -s, s)
        b = jax.random.uniform(kb, (1, dim), jnp.float32, -s, s)
        return w, b

    wq, bq = lin(ks[0]); wk, bk = lin(ks[1]); wv, bv = lin(ks[2]); wo, bo = lin(ks[3])
    qtok = jax.random.normal(ks[4], (1, dim), jnp.float32) / math.sqrt(dim)
    ones, zeros = jnp.ones((1, dim), jnp.float32), jnp.zeros((1, dim), jnp.float32)
    return dict(qtok=qtok, ln_g=ones, ln_b=zeros,
                wq=wq, bq=bq, wk=wk, bk=bk, wv=wv, bv=bv, wo=wo, bo=bo,
                qn_g=ones, qn_b=zeros, kn_g=ones, kn_b=zeros)


def init_final_params(key, dim):
    d3 = 3 * dim
    s = 1.0 / math.sqrt(d3)
    kw, kb = jax.random.split(key)
    return dict(g=jnp.ones((1, d3), jnp.float32), b=jnp.zeros((1, d3), jnp.float32),
                w=jax.random.uniform(kw, (d3, 1), jnp.float32, -s, s),
                bias=jax.random.uniform(kb, (1, 1), jnp.float32, -s, s))


# ---------------------------------------------------------------------------
# Pure-JAX f32 reference for correctness checking.
# ---------------------------------------------------------------------------
def cross_attn_ref(x, p, num_heads):
    B, N, D = x.shape
    hd = D // num_heads
    xn = _layernorm(x, p["ln_g"], p["ln_b"])
    q = _layernorm(p["qtok"] @ p["wq"] + p["bq"], p["qn_g"], p["qn_b"])   # (1, D)
    k = _layernorm(xn @ p["wk"] + p["bk"], p["kn_g"], p["kn_b"])          # (B, N, D)
    v = xn @ p["wv"] + p["bv"]
    q = jnp.broadcast_to(q[None], (B, 1, D)).reshape(B, 1, num_heads, hd).transpose(0, 2, 1, 3)
    k = k.reshape(B, N, num_heads, hd).transpose(0, 2, 1, 3)
    v = v.reshape(B, N, num_heads, hd).transpose(0, 2, 1, 3)
    s = jnp.einsum("bhqd,bhkd->bhqk", q, k) / math.sqrt(hd)
    w = jax.nn.softmax(s, axis=-1)
    o = jnp.einsum("bhqk,bhkd->bhqd", w, v).transpose(0, 2, 1, 3).reshape(B, 1, D)
    return o @ p["wo"] + p["bo"]


def head_ref(f15, f25, f27, params, num_heads):
    f15, f25, f27 = (a.astype(jnp.float32) for a in (f15, f25, f27))
    o15 = cross_attn_ref(f15, params["ca15"], num_heads)[:, 0, :]
    o25 = cross_attn_ref(f25, params["ca25"], num_heads)[:, 0, :]
    o27 = cross_attn_ref(f27, params["ca27"], num_heads)[:, 0, :]
    cat = jnp.concatenate([o15, o25, o27], axis=-1)
    fp = params["final"]
    return _layernorm(cat, fp["g"], fp["b"]) @ fp["w"] + fp["bias"]


if __name__ == "__main__":
    # Small TPU-friendly shapes: D lane-aligned (128), head_dim 32; the
    # (batch-block, branch, token-chunk) grid is (2, 3, 2) so every axis of
    # the fused kernel (parallel batch blocks, gated per-branch streaming,
    # online-softmax chunking, epilogue) is exercised.
    B, N, D, H = 16, 16, 128, 4
    TB, TN = 8, 8

    root = jax.random.PRNGKey(0)
    k15, k25, k27, kf, kx = jax.random.split(root, 5)
    params = dict(
        ca15=init_cross_attn_params(k15, D),
        ca25=init_cross_attn_params(k25, D),
        ca27=init_cross_attn_params(k27, D),
        final=init_final_params(kf, D),
    )

    kx1, kx2, kx3 = jax.random.split(kx, 3)
    # Hooked features arrive in bf16 (same bf16 values feed kernel + reference).
    feat_15 = jax.random.normal(kx1, (B, N, D), jnp.float32).astype(jnp.bfloat16)
    feat_25 = jax.random.normal(kx2, (B, N, D), jnp.float32).astype(jnp.bfloat16)
    feat_27 = jax.random.normal(kx3, (B, N, D), jnp.float32).astype(jnp.bfloat16)

    logit = apt_discriminator_head(feat_15, feat_25, feat_27, params, H,
                                   block_b=TB, block_n=TN)
    logit = jax.block_until_ready(logit)

    ref = head_ref(feat_15, feat_25, feat_27, params, H)
    # Tolerance accounts for bf16 feature streaming and bf16 matmul operands
    # (f32 accumulation) inside the kernel vs. the all-f32 reference.
    np.testing.assert_allclose(np.asarray(logit), np.asarray(ref), rtol=5e-2, atol=5e-2)
    assert logit.shape == (B, 1)

    print("KERNEL_OK")
</pallas_src>

<mosaic_0001>
module attributes {stable_mosaic.version = 11 : i64} {
  func.func @_head_kernel(%arg0: i32, %arg1: i32, %arg2: i32, %arg3: memref<8x8x128xbf16, #tpu.memory_space<vmem>>, %arg4: memref<8x8x128xbf16, #tpu.memory_space<vmem>>, %arg5: memref<8x8x128xbf16, #tpu.memory_space<vmem>>, %arg6: memref<1x128x128xbf16, #tpu.memory_space<vmem>>, %arg7: memref<1x1x128xf32, #tpu.memory_space<vmem>>, %arg8: memref<1x1x128xf32, #tpu.memory_space<vmem>>, %arg9: memref<1x1x128xf32, #tpu.memory_space<vmem>>, %arg10: memref<1x1x128xf32, #tpu.memory_space<vmem>>, %arg11: memref<1x128x256xbf16, #tpu.memory_space<vmem>>, %arg12: memref<1x1x256xf32, #tpu.memory_space<vmem>>, %arg13: memref<1x128x128xbf16, #tpu.memory_space<vmem>>, %arg14: memref<1x1x128xf32, #tpu.memory_space<vmem>>, %arg15: memref<3x1x128xf32, #tpu.memory_space<vmem>>, %arg16: memref<3x1x128xf32, #tpu.memory_space<vmem>>, %arg17: memref<3x1x128xf32, #tpu.memory_space<vmem>>, %arg18: memref<1x1xf32, #tpu.memory_space<vmem>>, %arg19: memref<8x1xf32, #tpu.memory_space<vmem>>, %arg20: memref<8x128xf32, #tpu.memory_space<vmem>>, %arg21: memref<8x128xf32, #tpu.memory_space<vmem>>, %arg22: memref<8x128xf32, #tpu.memory_space<vmem>>, %arg23: memref<3x8x128xf32, #tpu.memory_space<vmem>>) attributes {dimension_semantics = [#tpu.dimension_semantics<parallel>, #tpu.dimension_semantics<arbitrary>, #tpu.dimension_semantics<arbitrary>], iteration_bounds = array<i64: 2, 3, 2>, scalar_prefetch = 0 : i64, scratch_operands = 4 : i64, tpu.core_type = #tpu.core_type<tc>, window_params = [{transform_indices = @transform_0, window_bounds = array<i64: 8, 8, 128>}, {transform_indices = @transform_1, window_bounds = array<i64: 8, 8, 128>}, {transform_indices = @transform_2, window_bounds = array<i64: 8, 8, 128>}, {transform_indices = @transform_3, window_bounds = array<i64: 1, 128, 128>}, {transform_indices = @transform_4, window_bounds = array<i64: 1, 1, 128>}, {transform_indices = @transform_5, window_bounds = array<i64: 1, 1, 128>}, {transform_indices = @transform_6, window_bounds = array<i64: 1, 1, 128>}, {transform_indices = @transform_7, window_bounds = array<i64: 1, 1, 128>}, {transform_indices = @transform_8, window_bounds = array<i64: 1, 128, 256>}, {transform_indices = @transform_9, window_bounds = array<i64: 1, 1, 256>}, {transform_indices = @transform_10, window_bounds = array<i64: 1, 128, 128>}, {transform_indices = @transform_11, window_bounds = array<i64: 1, 1, 128>}, {pipeline_mode = #tpu.pipeline_mode<synchronous>, transform_indices = @transform_12, window_bounds = array<i64: 3, 1, 128>}, {pipeline_mode = #tpu.pipeline_mode<synchronous>, transform_indices = @transform_13, window_bounds = array<i64: 3, 1, 128>}, {pipeline_mode = #tpu.pipeline_mode<synchronous>, transform_indices = @transform_14, window_bounds = array<i64: 3, 1, 128>}, {pipeline_mode = #tpu.pipeline_mode<synchronous>, transform_indices = @transform_15, window_bounds = array<i64: 1, 1>}, {transform_indices = @transform_16, window_bounds = array<i64: 8, 1>}]} {
    %c0_i32 = arith.constant 0 : i32
    %0 = arith.cmpi eq, %arg1, %c0_i32 : i32
    %c0 = arith.constant 0 : index
    %c0_0 = arith.constant 0 : index
    %c0_1 = arith.constant 0 : index
    %1 = vector.load %arg3[%c0, %c0_0, %c0_1] : memref<8x8x128xbf16, #tpu.memory_space<vmem>>, vector<8x8x128xbf16>
    %c1_i32 = arith.constant 1 : i32
    %2 = arith.cmpi eq, %arg1, %c1_i32 : i32
    %c0_2 = arith.constant 0 : index
    %c0_3 = arith.constant 0 : index
    %c0_4 = arith.constant 0 : index
    %3 = vector.load %arg4[%c0_2, %c0_3, %c0_4] : memref<8x8x128xbf16, #tpu.memory_space<vmem>>, vector<8x8x128xbf16>
    %c0_5 = arith.constant 0 : index
    %c0_6 = arith.constant 0 : index
    %c0_7 = arith.constant 0 : index
    %4 = vector.load %arg5[%c0_5, %c0_6, %c0_7] : memref<8x8x128xbf16, #tpu.memory_space<vmem>>, vector<8x8x128xbf16>
    %5 = arith.select %2, %3, %4 : vector<8x8x128xbf16>
    %6 = arith.select %0, %1, %5 : vector<8x8x128xbf16>
    %c0_i32_8 = arith.constant 0 : i32
    %7 = arith.cmpi eq, %arg2, %c0_i32_8 : i32
    %8 = arith.extui %7 : i1 to i32
    %c0_i32_9 = arith.constant 0 : i32
    %9 = arith.cmpi ne, %8, %c0_i32_9 : i32
    scf.if %9 {
      %cst_61 = arith.constant -1.000000e+30 : f32
      %105 = vector.broadcast %cst_61 : f32 to vector<8x128xf32>
      %c0_62 = arith.constant 0 : index
      %c0_63 = arith.constant 0 : index
      %106 = vector.load %arg20[%c0_62, %c0_63] : memref<8x128xf32, #tpu.memory_space<vmem>>, vector<8x128xf32>
      tpu.vector_store %arg20[%c0_62, %c0_63], %105 {strides = array<i32>} : memref<8x128xf32, #tpu.memory_space<vmem>>, vector<8x128xf32>,
      %cst_64 = arith.constant 0.000000e+00 : f32
      %107 = vector.broadcast %cst_64 : f32 to vector<8x128xf32>
      %c0_65 = arith.constant 0 : index
      %c0_66 = arith.constant 0 : index
      %108 = vector.load %arg21[%c0_65, %c0_66] : memref<8x128xf32, #tpu.memory_space<vmem>>, vector<8x128xf32>
      tpu.vector_store %arg21[%c0_65, %c0_66], %107 {strides = array<i32>} : memref<8x128xf32, #tpu.memory_space<vmem>>, vector<8x128xf32>,
      %cst_67 = arith.constant 0.000000e+00 : f32
      %109 = vector.broadcast %cst_67 : f32 to vector<8x128xf32>
      %c0_68 = arith.constant 0 : index
      %c0_69 = arith.constant 0 : index
      %110 = vector.load %arg22[%c0_68, %c0_69] : memref<8x128xf32, #tpu.memory_space<vmem>>, vector<8x128xf32>
      tpu.vector_store %arg22[%c0_68, %c0_69], %109 {strides = array<i32>} : memref<8x128xf32, #tpu.memory_space<vmem>>, vector<8x128xf32>,
    } else {
    }
    %10 = vector.shape_cast %6 : vector<8x8x128xbf16> to vector<64x128xbf16>
    %11 = arith.extf %10 : vector<64x128xbf16> to vector<64x128xf32>
    %c0_10 = arith.constant 0 : index
    %c0_11 = arith.constant 0 : index
    %c0_12 = arith.constant 0 : index
    %12 = vector.load %arg7[%c0_10, %c0_11, %c0_12] : memref<1x1x128xf32, #tpu.memory_space<vmem>>, vector<1x1x128xf32>
    %13 = vector.shape_cast %12 : vector<1x1x128xf32> to vector<1x128xf32>
    %c0_13 = arith.constant 0 : index
    %c0_14 = arith.constant 0 : index
    %c0_15 = arith.constant 0 : index
    %14 = vector.load %arg8[%c0_13, %c0_14, %c0_15] : memref<1x1x128xf32, #tpu.memory_space<vmem>>, vector<1x1x128xf32>
    %15 = vector.shape_cast %14 : vector<1x1x128xf32> to vector<1x128xf32>
    %cst = arith.constant dense<0.000000e+00> : vector<64xf32>
    %16 = vector.multi_reduction <add>, %11, %cst [1] : vector<64x128xf32> to vector<64xf32>
    %17 = vector.shape_cast %16 : vector<64xf32> to vector<64x1xf32>
    %cst_16 = arith.constant 1.280000e+02 : f32
    %18 = vector.broadcast %cst_16 : f32 to vector<64x1xf32>
    %19 = arith.divf %17, %18 : vector<64x1xf32>
    %20 = vector.broadcast %19 : vector<64x1xf32> to vector<64x128xf32>
    %21 = arith.subf %11, %20 : vector<64x128xf32>
    %22 = arith.mulf %21, %21 : vector<64x128xf32>
    %cst_17 = arith.constant dense<0.000000e+00> : vector<64xf32>
    %23 = vector.multi_reduction <add>, %22, %cst_17 [1] : vector<64x128xf32> to vector<64xf32>
    %24 = vector.shape_cast %23 : vector<64xf32> to vector<64x1xf32>
    %cst_18 = arith.constant 1.280000e+02 : f32
    %25 = vector.broadcast %cst_18 : f32 to vector<64x1xf32>
    %26 = arith.divf %24, %25 : vector<64x1xf32>
    %cst_19 = arith.constant 9.99999997E-7 : f32
    %27 = vector.broadcast %cst_19 : f32 to vector<64x1xf32>
    %28 = arith.addf %26, %27 : vector<64x1xf32>
    %29 = math.rsqrt %28 : vector<64x1xf32>
    %30 = vector.broadcast %29 : vector<64x1xf32> to vector<64x128xf32>
    %31 = arith.mulf %21, %30 : vector<64x128xf32>
    %32 = vector.broadcast %13 : vector<1x128xf32> to vector<64x128xf32>
    %33 = arith.mulf %31, %32 : vector<64x128xf32>
    %34 = vector.broadcast %15 : vector<1x128xf32> to vector<64x128xf32>
    %35 = arith.addf %33, %34 : vector<64x128xf32>
    %36 = arith.truncf %35 : vector<64x128xf32> to vector<64x128xbf16>
    %c0_20 = arith.constant 0 : index
    %c0_21 = arith.constant 0 : index
    %c0_22 = arith.constant 0 : index
    %37 = vector.load %arg11[%c0_20, %c0_21, %c0_22] : memref<1x128x256xbf16, #tpu.memory_space<vmem>>, vector<1x128x256xbf16>
    %38 = vector.shape_cast %37 : vector<1x128x256xbf16> to vector<128x256xbf16>
    %cst_23 = arith.constant dense<0.000000e+00> : vector<64x256xf32>
    %39 = tpu.matmul %36, %38, %cst_23 {dimension_numbers = #tpu.dot_dimension_numbers<[1], [0], [0], [1], [0, 0, 1, 1], [], []>} : vector<64x128xbf16>, vector<128x256xbf16>, vector<64x256xf32> -> vector<64x256xf32>
    %c0_24 = arith.constant 0 : index
    %c0_25 = arith.constant 0 : index
    %c0_26 = arith.constant 0 : index
    %40 = vector.load %arg12[%c0_24, %c0_25, %c0_26] : memref<1x1x256xf32, #tpu.memory_space<vmem>>, vector<1x1x256xf32>
    %41 = vector.shape_cast %40 : vector<1x1x256xf32> to vector<1x256xf32>
    %42 = vector.broadcast %41 : vector<1x256xf32> to vector<64x256xf32>
    %43 = arith.addf %39, %42 : vector<64x256xf32>
    %44 = vector.extract_strided_slice %43 {offsets = [0, 0], sizes = [64, 128], strides = [1, 1]} : vector<64x256xf32> to vector<64x128xf32>
    %c0_27 = arith.constant 0 : index
    %c0_28 = arith.constant 0 : index
    %c0_29 = arith.constant 0 : index
    %45 = vector.load %arg9[%c0_27, %c0_28, %c0_29] : memref<1x1x128xf32, #tpu.memory_space<vmem>>, vector<1x1x128xf32>
    %46 = vector.shape_cast %45 : vector<1x1x128xf32> to vector<1x128xf32>
    %c0_30 = arith.constant 0 : index
    %c0_31 = arith.constant 0 : index
    %c0_32 = arith.constant 0 : index
    %47 = vector.load %arg10[%c0_30, %c0_31, %c0_32] : memref<1x1x128xf32, #tpu.memory_space<vmem>>, vector<1x1x128xf32>
    %48 = vector.shape_cast %47 : vector<1x1x128xf32> to vector<1x128xf32>
    %cst_33 = arith.constant dense<0.000000e+00> : vector<64xf32>
    %49 = vector.multi_reduction <add>, %44, %cst_33 [1] : vector<64x128xf32> to vector<64xf32>
    %50 = vector.shape_cast %49 : vector<64xf32> to vector<64x1xf32>
    %cst_34 = arith.constant 1.280000e+02 : f32
    %51 = vector.broadcast %cst_34 : f32 to vector<64x1xf32>
    %52 = arith.divf %50, %51 : vector<64x1xf32>
    %53 = vector.broadcast %52 : vector<64x1xf32> to vector<64x128xf32>
    %54 = arith.subf %44, %53 : vector<64x128xf32>
    %55 = arith.mulf %54, %54 : vector<64x128xf32>
    %cst_35 = arith.constant dense<0.000000e+00> : vector<64xf32>
    %56 = vector.multi_reduction <add>, %55, %cst_35 [1] : vector<64x128xf32> to vector<64xf32>
    %57 = vector.shape_cast %56 : vector<64xf32> to vector<64x1xf32>
    %cst_36 = arith.constant 1.280000e+02 : f32
    %58 = vector.broadcast %cst_36 : f32 to vector<64x1xf32>
    %59 = arith.divf %57, %58 : vector<64x1xf32>
    %cst_37 = arith.constant 9.99999997E-7 : f32
    %60 = vector.broadcast %cst_37 : f32 to vector<64x1xf32>
    %61 = arith.addf %59, %60 : vector<64x1xf32>
    %62 = math.rsqrt %61 : vector<64x1xf32>
    %63 = vector.broadcast %62 : vector<64x1xf32> to vector<64x128xf32>
    %64 = arith.mulf %54, %63 : vector<64x128xf32>
    %65 = vector.broadcast %46 : vector<1x128xf32> to vector<64x128xf32>
    %66 = arith.mulf %64, %65 : vector<64x128xf32>
    %67 = vector.broadcast %48 : vector<1x128xf32> to vector<64x128xf32>
    %68 = arith.addf %66, %67 : vector<64x128xf32>
    %69 = vector.extract_strided_slice %43 {offsets = [0, 128], sizes = [64, 128], strides = [1, 1]} : vector<64x256xf32> to vector<64x128xf32>
    %70 = vector.shape_cast %69 : vector<64x128xf32> to vector<8x8x128xf32>
    %71 = arith.truncf %68 : vector<64x128xf32> to vector<64x128xbf16>
    %c0_38 = arith.constant 0 : index
    %c0_39 = arith.constant 0 : index
    %c0_40 = arith.constant 0 : index
    %72 = vector.load %arg6[%c0_38, %c0_39, %c0_40] : memref<1x128x128xbf16, #tpu.memory_space<vmem>>, vector<1x128x128xbf16>
    %73 = vector.shape_cast %72 : vector<1x128x128xbf16> to vector<128x128xbf16>
    %cst_41 = arith.constant dense<0.000000e+00> : vector<64x128xf32>
    %74 = tpu.matmul %71, %73, %cst_41 {dimension_numbers = #tpu.dot_dimension_numbers<[1], [0], [0], [1], [0, 0, 1, 1], [], []>} : vector<64x128xbf16>, vector<128x128xbf16>, vector<64x128xf32> -> vector<64x128xf32>
    %75 = vector.shape_cast %74 : vector<64x128xf32> to vector<8x8x128xf32>
    %c0_42 = arith.constant 0 : index
    %c0_43 = arith.constant 0 : index
    %76 = vector.load %arg20[%c0_42, %c0_43] : memref<8x128xf32, #tpu.memory_space<vmem>>, vector<8x128xf32>
    %cst_44 = arith.constant dense<0xFF800000> : vector<8x128xf32>
    %77 = vector.multi_reduction <maximumf>, %75, %cst_44 [1] : vector<8x8x128xf32> to vector<8x128xf32>
    %78 = arith.maximumf %76, %77 : vector<8x128xf32>
    %79 = arith.subf %76, %78 : vector<8x128xf32>
    %80 = math.exp %79 : vector<8x128xf32>
    %81 = vector.shape_cast %78 : vector<8x128xf32> to vector<8x1x128xf32>
    %82 = vector.broadcast %81 : vector<8x1x128xf32> to vector<8x8x128xf32>
    %83 = arith.subf %75, %82 : vector<8x8x128xf32>
    %84 = math.exp %83 : vector<8x8x128xf32>
    %c0_45 = arith.constant 0 : index
    %c0_46 = arith.constant 0 : index
    %85 = vector.load %arg21[%c0_45, %c0_46] : memref<8x128xf32, #tpu.memory_space<vmem>>, vector<8x128xf32>
    %86 = arith.mulf %80, %85 : vector<8x128xf32>
    %cst_47 = arith.constant dense<0.000000e+00> : vector<8x128xf32>
    %87 = vector.multi_reduction <add>, %84, %cst_47 [1] : vector<8x8x128xf32> to vector<8x128xf32>
    %88 = arith.addf %86, %87 : vector<8x128xf32>
    %c0_48 = arith.constant 0 : index
    %c0_49 = arith.constant 0 : index
    %89 = vector.load %arg21[%c0_48, %c0_49] : memref<8x128xf32, #tpu.memory_space<vmem>>, vector<8x128xf32>
    tpu.vector_store %arg21[%c0_48, %c0_49], %88 {strides = array<i32>} : memref<8x128xf32, #tpu.memory_space<vmem>>, vector<8x128xf32>,
    %c0_50 = arith.constant 0 : index
    %c0_51 = arith.constant 0 : index
    %90 = vector.load %arg22[%c0_50, %c0_51] : memref<8x128xf32, #tpu.memory_space<vmem>>, vector<8x128xf32>
    %91 = arith.mulf %80, %90 : vector<8x128xf32>
    %92 = arith.mulf %84, %70 : vector<8x8x128xf32>
    %cst_52 = arith.constant dense<0.000000e+00> : vector<8x128xf32>
    %93 = vector.multi_reduction <add>, %92, %cst_52 [1] : vector<8x8x128xf32> to vector<8x128xf32>
    %94 = arith.addf %91, %93 : vector<8x128xf32>
    %c0_53 = arith.constant 0 : index
    %c0_54 = arith.constant 0 : index
    %95 = vector.load %arg22[%c0_53, %c0_54] : memref<8x128xf32, #tpu.memory_space<vmem>>, vector<8x128xf32>
    tpu.vector_store %arg22[%c0_53, %c0_54], %94 {strides = array<i32>} : memref<8x128xf32, #tpu.memory_space<vmem>>, vector<8x128xf32>,
    %c0_55 = arith.constant 0 : index
    %c0_56 = arith.constant 0 : index
    %96 = vector.load %arg20[%c0_55, %c0_56] : memref<8x128xf32, #tpu.memory_space<vmem>>, vector<8x128xf32>
    tpu.vector_store %arg20[%c0_55, %c0_56], %78 {strides = array<i32>} : memref<8x128xf32, #tpu.memory_space<vmem>>, vector<8x128xf32>,
    %c1_i32_57 = arith.constant 1 : i32
    %97 = arith.cmpi eq, %arg2, %c1_i32_57 : i32
    %98 = arith.extui %97 : i1 to i32
    %c0_i32_58 = arith.constant 0 : i32
    %99 = arith.cmpi ne, %98, %c0_i32_58 : i32
    scf.if %99 {
      %c0_61 = arith.constant 0 : index
      %c0_62 = arith.constant 0 : index
      %105 = vector.load %arg22[%c0_61, %c0_62] : memref<8x128xf32, #tpu.memory_space<vmem>>, vector<8x128xf32>
      %c0_63 = arith.constant 0 : index
      %c0_64 = arith.constant 0 : index
      %106 = vector.load %arg21[%c0_63, %c0_64] : memref<8x128xf32, #tpu.memory_space<vmem>>, vector<8x128xf32>
      %107 = arith.divf %105, %106 : vector<8x128xf32>
      %108 = arith.truncf %107 : vector<8x128xf32> to vector<8x128xbf16>
      %c0_65 = arith.constant 0 : index
      %c0_66 = arith.constant 0 : index
      %c0_67 = arith.constant 0 : index
      %109 = vector.load %arg13[%c0_65, %c0_66, %c0_67] : memref<1x128x128xbf16, #tpu.memory_space<vmem>>, vector<1x128x128xbf16>
      %110 = vector.shape_cast %109 : vector<1x128x128xbf16> to vector<128x128xbf16>
      %cst_68 = arith.constant dense<0.000000e+00> : vector<8x128xf32>
      %111 = tpu.matmul %108, %110, %cst_68 {dimension_numbers = #tpu.dot_dimension_numbers<[1], [0], [0], [1], [0, 0, 1, 1], [], []>} : vector<8x128xbf16>, vector<128x128xbf16>, vector<8x128xf32> -> vector<8x128xf32>
      %c0_69 = arith.constant 0 : index
      %c0_70 = arith.constant 0 : index
      %c0_71 = arith.constant 0 : index
      %112 = vector.load %arg14[%c0_69, %c0_70, %c0_71] : memref<1x1x128xf32, #tpu.memory_space<vmem>>, vector<1x1x128xf32>
      %113 = vector.shape_cast %112 : vector<1x1x128xf32> to vector<1x128xf32>
      %114 = vector.broadcast %113 : vector<1x128xf32> to vector<8x128xf32>
      %115 = arith.addf %111, %114 : vector<8x128xf32>
      %116 = arith.index_cast %arg1 : i32 to index
      %c0_72 = arith.constant 0 : index
      %c0_73 = arith.constant 0 : index
      %117 = vector.load %arg23[%116, %c0_72, %c0_73] : memref<3x8x128xf32, #tpu.memory_space<vmem>>, vector<1x8x128xf32>
      %118 = vector.shape_cast %117 : vector<1x8x128xf32> to vector<8x128xf32>
      %119 = vector.shape_cast %115 : vector<8x128xf32> to vector<1x8x128xf32>
      tpu.vector_store %arg23[%116, %c0_72, %c0_73], %119 {strides = array<i32>} : memref<3x8x128xf32, #tpu.memory_space<vmem>>, vector<1x8x128xf32>,
    } else {
    }
    %c2_i32 = arith.constant 2 : i32
    %100 = arith.cmpi eq, %arg1, %c2_i32 : i32
    %c1_i32_59 = arith.constant 1 : i32
    %101 = arith.cmpi eq, %arg2, %c1_i32_59 : i32
    %102 = arith.andi %100, %101 : i1
    %103 = arith.extui %102 : i1 to i32
    %c0_i32_60 = arith.constant 0 : i32
    %104 = arith.cmpi ne, %103, %c0_i32_60 : i32
    scf.if %104 {
      %c0_61 = arith.constant 0 : index
      %c0_62 = arith.constant 0 : index
      %c0_63 = arith.constant 0 : index
      %105 = vector.load %arg23[%c0_61, %c0_62, %c0_63] : memref<3x8x128xf32, #tpu.memory_space<vmem>>, vector<3x8x128xf32>
      %cst_64 = arith.constant dense<0.000000e+00> : vector<8x128xf32>
      %106 = vector.multi_reduction <add>, %105, %cst_64 [0] : vector<3x8x128xf32> to vector<8x128xf32>
      %107 = vector.shape_cast %106 : vector<8x128xf32> to vector<1x8x128xf32>
      %cst_65 = arith.constant dense<0.000000e+00> : vector<1x8xf32>
      %108 = vector.multi_reduction <add>, %107, %cst_65 [2] : vector<1x8x128xf32> to vector<1x8xf32>
      %109 = vector.shape_cast %108 : vector<1x8xf32> to vector<1x8x1xf32>
      %cst_66 = arith.constant 3.840000e+02 : f32
      %110 = vector.broadcast %cst_66 : f32 to vector<1x8x1xf32>
      %111 = arith.divf %109, %110 : vector<1x8x1xf32>
      %112 = vector.broadcast %111 : vector<1x8x1xf32> to vector<3x8x128xf32>
      %113 = arith.subf %105, %112 : vector<3x8x128xf32>
      %114 = arith.mulf %113, %113 : vector<3x8x128xf32>
      %cst_67 = arith.constant dense<0.000000e+00> : vector<8x128xf32>
      %115 = vector.multi_reduction <add>, %114, %cst_67 [0] : vector<3x8x128xf32> to vector<8x128xf32>
      %116 = vector.shape_cast %115 : vector<8x128xf32> to vector<1x8x128xf32>
      %cst_68 = arith.constant dense<0.000000e+00> : vector<1x8xf32>
      %117 = vector.multi_reduction <add>, %116, %cst_68 [2] : vector<1x8x128xf32> to vector<1x8xf32>
      %118 = vector.shape_cast %117 : vector<1x8xf32> to vector<1x8x1xf32>
      %cst_69 = arith.constant 3.840000e+02 : f32
      %119 = vector.broadcast %cst_69 : f32 to vector<1x8x1xf32>
      %120 = arith.divf %118, %119 : vector<1x8x1xf32>
      %cst_70 = arith.constant 9.99999997E-7 : f32
      %121 = vector.broadcast %cst_70 : f32 to vector<1x8x1xf32>
      %122 = arith.addf %120, %121 : vector<1x8x1xf32>
      %123 = math.rsqrt %122 : vector<1x8x1xf32>
      %124 = vector.broadcast %123 : vector<1x8x1xf32> to vector<3x8x128xf32>
      %125 = arith.mulf %113, %124 : vector<3x8x128xf32>
      %c0_71 = arith.constant 0 : index
      %c0_72 = arith.constant 0 : index
      %c0_73 = arith.constant 0 : index
      %126 = vector.load %arg15[%c0_71, %c0_72, %c0_73] : memref<3x1x128xf32, #tpu.memory_space<vmem>>, vector<3x1x128xf32>
      %127 = vector.broadcast %126 : vector<3x1x128xf32> to vector<3x8x128xf32>
      %128 = arith.mulf %125, %127 : vector<3x8x128xf32>
      %c0_74 = arith.constant 0 : index
      %c0_75 = arith.constant 0 : index
      %c0_76 = arith.constant 0 : index
      %129 = vector.load %arg16[%c0_74, %c0_75, %c0_76] : memref<3x1x128xf32, #tpu.memory_space<vmem>>, vector<3x1x128xf32>
      %130 = vector.broadcast %129 : vector<3x1x128xf32> to vector<3x8x128xf32>
      %131 = arith.addf %128, %130 : vector<3x8x128xf32>
      %c0_77 = arith.constant 0 : index
      %c0_78 = arith.constant 0 : index
      %c0_79 = arith.constant 0 : index
      %132 = vector.load %arg17[%c0_77, %c0_78, %c0_79] : memref<3x1x128xf32, #tpu.memory_space<vmem>>, vector<3x1x128xf32>
      %133 = vector.broadcast %132 : vector<3x1x128xf32> to vector<3x8x128xf32>
      %134 = arith.mulf %131, %133 : vector<3x8x128xf32>
      %cst_80 = arith.constant dense<0.000000e+00> : vector<8x128xf32>
      %135 = vector.multi_reduction <add>, %134, %cst_80 [0] : vector<3x8x128xf32> to vector<8x128xf32>
      %cst_81 = arith.constant dense<0.000000e+00> : vector<8xf32>
      %136 = vector.multi_reduction <add>, %135, %cst_81 [1] : vector<8x128xf32> to vector<8xf32>
      %137 = vector.shape_cast %136 : vector<8xf32> to vector<8x1xf32>
      %c0_82 = arith.constant 0 : index
      %c0_83 = arith.constant 0 : index
      %138 = vector.load %arg18[%c0_82, %c0_83] : memref<1x1xf32, #tpu.memory_space<vmem>>, vector<1x1xf32>
      %139 = vector.broadcast %138 : vector<1x1xf32> to vector<8x1xf32>
      %140 = arith.addf %137, %139 : vector<8x1xf32>
      %c0_84 = arith.constant 0 : index
      %c0_85 = arith.constant 0 : index
      %141 = vector.load %arg19[%c0_84, %c0_85] : memref<8x1xf32, #tpu.memory_space<vmem>>, vector<8x1xf32>
      tpu.vector_store %arg19[%c0_84, %c0_85], %140 {strides = array<i32>} : memref<8x1xf32, #tpu.memory_space<vmem>>, vector<8x1xf32>,
    } else {
    }
    return
  }
  func.func @transform_0(%arg0: i32, %arg1: i32, %arg2: i32) -> (i32, i32, i32) {
    %c0_i32 = arith.constant 0 : i32
    %0 = arith.cmpi eq, %arg1, %c0_i32 : i32
    %c0_i32_0 = arith.constant 0 : i32
    %1 = arith.select %0, %arg2, %c0_i32_0 : i32
    %c0_i32_1 = arith.constant 0 : i32
    %c0_i32_2 = arith.constant 0 : i32
    return %arg0, %1, %c0_i32_1 : i32, i32, i32
  }
  func.func @transform_1(%arg0: i32, %arg1: i32, %arg2: i32) -> (i32, i32, i32) {
    %c1_i32 = arith.constant 1 : i32
    %0 = arith.cmpi eq, %arg1, %c1_i32 : i32
    %c0_i32 = arith.constant 0 : i32
    %1 = arith.select %0, %arg2, %c0_i32 : i32
    %c0_i32_0 = arith.constant 0 : i32
    %c0_i32_1 = arith.constant 0 : i32
    return %arg0, %1, %c0_i32_0 : i32, i32, i32
  }
  func.func @transform_2(%arg0: i32, %arg1: i32, %arg2: i32) -> (i32, i32, i32) {
    %c2_i32 = arith.constant 2 : i32
    %0 = arith.cmpi eq, %arg1, %c2_i32 : i32
    %c0_i32 = arith.constant 0 : i32
    %1 = arith.select %0, %arg2, %c0_i32 : i32
    %c0_i32_0 = arith.constant 0 : i32
    %c0_i32_1 = arith.constant 0 : i32
    return %arg0, %1, %c0_i32_0 : i32, i32, i32
  }
  func.func @transform_3(%arg0: i32, %arg1: i32, %arg2: i32) -> (i32, i32, i32) {
    %c0_i32 = arith.constant 0 : i32
    %c0_i32_0 = arith.constant 0 : i32
    %c0_i32_1 = arith.constant 0 : i32
    return %arg1, %c0_i32, %c0_i32_0 : i32, i32, i32
  }
  func.func @transform_4(%arg0: i32, %arg1: i32, %arg2: i32) -> (i32, i32, i32) {
    %c0_i32 = arith.constant 0 : i32
    %c0_i32_0 = arith.constant 0 : i32
    %c0_i32_1 = arith.constant 0 : i32
    return %arg1, %c0_i32, %c0_i32_0 : i32, i32, i32
  }
  func.func @transform_5(%arg0: i32, %arg1: i32, %arg2: i32) -> (i32, i32, i32) {
    %c0_i32 = arith.constant 0 : i32
    %c0_i32_0 = arith.constant 0 : i32
    %c0_i32_1 = arith.constant 0 : i32
    return %arg1, %c0_i32, %c0_i32_0 : i32, i32, i32
  }
  func.func @transform_6(%arg0: i32, %arg1: i32, %arg2: i32) -> (i32, i32, i32) {
    %c0_i32 = arith.constant 0 : i32
    %c0_i32_0 = arith.constant 0 : i32
    %c0_i32_1 = arith.constant 0 : i32
    return %arg1, %c0_i32, %c0_i32_0 : i32, i32, i32
  }
  func.func @transform_7(%arg0: i32, %arg1: i32, %arg2: i32) -> (i32, i32, i32) {
    %c0_i32 = arith.constant 0 : i32
    %c0_i32_0 = arith.constant 0 : i32
    %c0_i32_1 = arith.constant 0 : i32
    return %arg1, %c0_i32, %c0_i32_0 : i32, i32, i32
  }
  func.func @transform_8(%arg0: i32, %arg1: i32, %arg2: i32) -> (i32, i32, i32) {
    %c0_i32 = arith.constant 0 : i32
    %c0_i32_0 = arith.constant 0 : i32
    %c0_i32_1 = arith.constant 0 : i32
    return %arg1, %c0_i32, %c0_i32_0 : i32, i32, i32
  }
  func.func @transform_9(%arg0: i32, %arg1: i32, %arg2: i32) -> (i32, i32, i32) {
    %c0_i32 = arith.constant 0 : i32
    %c0_i32_0 = arith.constant 0 : i32
    %c0_i32_1 = arith.constant 0 : i32
    return %arg1, %c0_i32, %c0_i32_0 : i32, i32, i32
  }
  func.func @transform_10(%arg0: i32, %arg1: i32, %arg2: i32) -> (i32, i32, i32) {
    %c0_i32 = arith.constant 0 : i32
    %c0_i32_0 = arith.constant 0 : i32
    %c0_i32_1 = arith.constant 0 : i32
    return %arg1, %c0_i32, %c0_i32_0 : i32, i32, i32
  }
  func.func @transform_11(%arg0: i32, %arg1: i32, %arg2: i32) -> (i32, i32, i32) {
    %c0_i32 = arith.constant 0 : i32
    %c0_i32_0 = arith.constant 0 : i32
    %c0_i32_1 = arith.constant 0 : i32
    return %arg1, %c0_i32, %c0_i32_0 : i32, i32, i32
  }
  func.func @transform_12(%arg0: i32, %arg1: i32, %arg2: i32) -> (i32, i32, i32) {
    %c0_i32 = arith.constant 0 : i32
    %c0_i32_0 = arith.constant 0 : i32
    %c0_i32_1 = arith.constant 0 : i32
    %c0_i32_2 = arith.constant 0 : i32
    return %c0_i32, %c0_i32_0, %c0_i32_1 : i32, i32, i32
  }
  func.func @transform_13(%arg0: i32, %arg1: i32, %arg2: i32) -> (i32, i32, i32) {
    %c0_i32 = arith.constant 0 : i32
    %c0_i32_0 = arith.constant 0 : i32
    %c0_i32_1 = arith.constant 0 : i32
    %c0_i32_2 = arith.constant 0 : i32
    return %c0_i32, %c0_i32_0, %c0_i32_1 : i32, i32, i32
  }
  func.func @transform_14(%arg0: i32, %arg1: i32, %arg2: i32) -> (i32, i32, i32) {
    %c0_i32 = arith.constant 0 : i32
    %c0_i32_0 = arith.constant 0 : i32
    %c0_i32_1 = arith.constant 0 : i32
    %c0_i32_2 = arith.constant 0 : i32
    return %c0_i32, %c0_i32_0, %c0_i32_1 : i32, i32, i32
  }
  func.func @transform_15(%arg0: i32, %arg1: i32, %arg2: i32) -> (i32, i32) {
    %c0_i32 = arith.constant 0 : i32
    %c0_i32_0 = arith.constant 0 : i32
    %c0_i32_1 = arith.constant 0 : i32
    return %c0_i32, %c0_i32_0 : i32, i32
  }
  func.func @transform_16(%arg0: i32, %arg1: i32, %arg2: i32) -> (i32, i32) {
    %c0_i32 = arith.constant 0 : i32
    %c0_i32_0 = arith.constant 0 : i32
    return %arg0, %c0_i32 : i32, i32
  }
}

</mosaic_0001>

<bundles_post_ra>
// kernel: tpu_custom_call.1
= control target key start
LH: loop header
LB: loop body
LE: loop exit
PB: predicated region body
PF: predicated region fallthrough
CT: control target
= control target key end

     0   :  { %s4558_s0 = inlined_call_operand.hbm [shape: bf16[16,16,128], index: 0, kind: input, shape index: {}]   ;;  %s4559_s1 = inlined_call_operand.hbm [shape: bf16[16,16,128], index: 1, kind: input, shape index: {}]   ;;  %s4560_s2 = inlined_call_operand.hbm [shape: bf16[16,16,128], index: 2, kind: input, shape index: {}]   ;;  %s4561_s3 = inlined_call_operand.hbm [shape: bf16[3,128,128], index: 3, kind: input, shape index: {}]   ;;  %s4562_s4 = inlined_call_operand.vmem [shape: f32[3,1,128], index: 4, kind: input, shape index: {}]   ;;  %s4563_s5 = inlined_call_operand.hbm [shape: f32[3,1,128], index: 5, kind: input, shape index: {}]   ;;  %s4564_s6 = inlined_call_operand.hbm [shape: f32[3,1,128], index: 6, kind: input, shape index: {}]   ;;  %s4565_s7 = inlined_call_operand.hbm [shape: f32[3,1,128], index: 7, kind: input, shape index: {}]   ;;  %s4566_s8 = inlined_call_operand.hbm [shape: bf16[3,128,256], index: 8, kind: input, shape index: {}]   ;;  %s4567_s9 = inlined_call_operand.vmem [shape: f32[3,1,256], index: 9, kind: input, shape index: {}]   ;;  %s4568_s10 = inlined_call_operand.hbm [shape: bf16[3,128,128], index: 10, kind: input, shape index: {}]   ;;  %s4569_s11 = inlined_call_operand.vmem [shape: f32[3,1,128], index: 11, kind: input, shape index: {}]   ;;  %s4570_s12 = inlined_call_operand.hbm [shape: f32[3,1,128], index: 12, kind: input, shape index: {}]   ;;  %s4571_s13 = inlined_call_operand.hbm [shape: f32[3,1,128], index: 13, kind: input, shape index: {}]   ;;  %s4572_s14 = inlined_call_operand.vmem [shape: f32[3,1,128], index: 14, kind: input, shape index: {}]   ;;  %s4573_s15 = inlined_call_operand.<no memory space> [shape: f32[1,1], index: 15, kind: input, shape index: {}]   ;;  %s4574_s16 = inlined_call_operand.vmem [shape: f32[16,1], index: 16, kind: output, shape index: {}]  }
   0x1   :  { %4614 = sst [smem:[#allocation56_spill]] %s4558_s0  ;;  %v21_v0 = vstv %s4573_s15 }
   0x2   :  { %4615 = sst [smem:[#allocation57_spill]] %s4559_s1  ;;  %22 = vst [vmem:[#allocation6] sm:$0x1] %v21_v0 }
   0x3   :  { %4616 = sst [smem:[#allocation58_spill]] %s4560_s2 }
   0x4   :  { %4617 = sst [smem:[#allocation59_spill]] %s4561_s3 }
   0x5   :  { %4618 = sst [smem:[#allocation60_spill]] %s4562_s4 }
   0x6   :  { %4619 = sst [smem:[#allocation61_spill]] %s4563_s5 }
   0x7   :  { %4620 = sst [smem:[#allocation62_spill]] %s4564_s6 }
   0x8   :  { %4621 = sst [smem:[#allocation63_spill]] %s4565_s7 }
   0x9   :  { %4622 = sst [smem:[#allocation64_spill]] %s4566_s8 }
   0xa   :  { %4623 = sst [smem:[#allocation65_spill]] %s4567_s9 }
   0xb   :  { %4624 = sst [smem:[#allocation66_spill]] %s4568_s10 }
   0xc   :  { %4625 = sst [smem:[#allocation67_spill]] %s4569_s11 }
   0xd   :  { %4626 = sst [smem:[#allocation68_spill]] %s4570_s12 }
   0xe   :  { %4627 = sst [smem:[#allocation69_spill]] %s4571_s13 }
   0xf   :  { %4628 = sst [smem:[#allocation70_spill]] %s4572_s14 }
  0x10   :  { %4629 = sst [smem:[#allocation71_spill]] %s4574_s16 }
  0x11   :  { %23 = vsyncpa [#allocation8], 0 }
  0x12   :  { %25 = vsyncpa [#allocation8 + $0x1], 0 }
  0x13   :  { %26 = vsyncpa [#allocation10], 0 }
  0x14   :  { %28 = vsyncpa [#allocation10 + $0x1], 0 }
  0x15   :  { %29 = vsyncpa [#allocation13], 0 }
  0x16   :  { %31 = vsyncpa [#allocation13 + $0x1], 0 }
  0x17   :  { %32 = vsyncpa [#allocation16], 0 }
  0x18   :  { %34 = vsyncpa [#allocation16 + $0x1], 0 }
  0x19   :  { %35 = vsyncpa [#allocation19], 0 }
  0x1a   :  { %37 = vsyncpa [#allocation19 + $0x1], 0 }
  0x1b   :  { %38 = vsyncpa [#allocation22], 0  ;;  %s3587_s23 = smov 0   ;;  %s3589_s24 = smov 0  }
  0x1c   :  { %s3591_s25 = smov 0   ;;  %s3593_s26 = smov 0  }
  0x1d   :  { %s3595_s15 = smov 0   ;;  %s3597_s27 = smov 0  }
  0x1e   :  { %s3599_s28 = smov 0   ;;  %s3601_s29 = smov 0  }
  0x1f   :  { %s3603_s30 = smov 0   ;;  %s3605_s0 = smov 0  }
  0x20   :  { %s3607_s17 = smov 0   ;;  %s3609_s18 = smov 0  }
  0x21   :  { %s3611_s19 = smov 0   ;;  %s3613_s20 = smov 0  }
  0x22   :  { %s3615_s21 = smov 0   ;;  %s3617_s22 = smov 0  }
  0x23   :  { %s3619_s14 = smov 0   ;;  %s3621_s16 = smov 0  }
  0x24   :  { %s3623_s11 = smov 0  }
  0x25 LB: > { %4630 = sst [smem:[#allocation31_spill]] %s3417_s24  ;;  %s4579_s9 = sadd.s32 4294967295, %s3485_s11   ;;  %s3485_s11 = sphi %s3623_s11, %s44_s11   ;;  %s3481_s16 = sphi %s3621_s16, %s4744_s16   ;;  %s3477_s14 = sphi %s3619_s14, %s4749_s14   ;;  %s3473_s22 = sphi %s3617_s22, %s4742_s22   ;;  %s3469_s21 = sphi %s3615_s21, %s4741_s21   ;;  %s3465_s20 = sphi %s3613_s20, %s4748_s20   ;;  %s3461_s19 = sphi %s3611_s19, %s4740_s19   ;;  %s3457_s18 = sphi %s3609_s18, %s4747_s18   ;;  %s3453_s17 = sphi %s3607_s17, %s4746_s17   ;;  %s3449_s0 = sphi %s3605_s0, %s4739_s0   ;;  %s3445_s30 = sphi %s3603_s30, %s4738_s30   ;;  %s3441_s29 = sphi %s3601_s29, %s4737_s29   ;;  %s3437_s28 = sphi %s3599_s28, %s4736_s28   ;;  %s3433_s27 = sphi %s3597_s27, %s4745_s27   ;;  %s3429_s15 = sphi %s3595_s15, %s4735_s15   ;;  %s3425_s26 = sphi %s3593_s26, %s4734_s26   ;;  %s3421_s25 = sphi %s3591_s25, %s4733_s25   ;;  %s3417_s24 = sphi %s3589_s24, %s4732_s24   ;;  %s3413_s23 = sphi %s3587_s23, %s4731_s23  }
  0x26   : > { %4631 = sst [smem:[#allocation32_spill]] %s3421_s25  ;;  %p2459_p0 = scmp.ge.s32.totalorder %s3485_s11, 1 }
  0x27   : > { %4632 = sst [smem:[#allocation33_spill]] %s3425_s26  ;;  %p3686_p1 = scmp.eq.s32.totalorder %s4579_s9, 0 }
  0x28   : > { %4633 = sst [smem:[#allocation34_spill]] %s3429_s15  ;;  %p508_p2 = scmp.lt.s32.totalorder %s3485_s11, 13 }
  0x29   : > { %4634 = sst [smem:[#allocation35_spill]] %s3433_s27  ;;  %s3487_s9 = smov [#allocation21]  }
  0x2a   : > { %4635 = sst [smem:[#allocation36_spill]] %s3441_s29  ;;  %p3694_p3 = pnand %p2459_p0, %p508_p2 }
  0x2b   : > { %4636 = sst [smem:[#allocation37_spill]] %s3445_s30  ;;  %s521_s5 = sshll.u32 %s3487_s9, 4  ;;  %s522_s5 = int_to_ptr.vmem [resolvable:$true] %s521_s5 }
  0x2c   : > { %4637 = sst [smem:[#allocation38_spill]] %s3449_s0  ;;  %p2700_p4 = pneg %p3694_p3 }
  0x2d   : > { %4638 = sst [smem:[#allocation39_spill]] %s3453_s17  ;;  %s56_s9 = sadd.s32 1, %s3473_s22 }
  0x2e   : > { %4639 = sst [smem:[#allocation40_spill]] %s3461_s19  ;;  %p3702_p5 = pnand %p2700_p4, %p3686_p1 }
  0x2f   : > { %4640 = sst [smem:[#allocation41_spill]] %s3465_s20  ;;  %p57_p6 = scmp.ge.s32.totalorder %s56_s9, 2 }
  0x30   : > { %4641 = sst [smem:[#allocation42_spill]] %s3469_s21  ;;  %s4581_s21 = smov 16  }
  0x31   : > { %4642 = sst [smem:[#allocation43_spill]] %s3473_s22  ;;  %s63_s2 = sadd.s32 1, %s3481_s16 }
  0x32   : > { %4643 = sst [smem:[#allocation44_spill]] %s3481_s16  ;;  %p84_p7 = scmp.eq.s32.totalorder %s3485_s11, 0 }
  0x33   : > { %s4645_s12 = sld [smem:[#allocation68_spill]]  ;;  %s4751_s9 = smov (%p57_p6, %s56_s9), 0 }
  0x34   : > { %s4646_s7 = scalar_select %p3694_p3, 1, 0 }
  0x35   : > { %4649 = sst [smem:[#allocation46_spill]] %s4751_s9  ;;  %p99_p8 = scmp.eq.s32.totalorder %s3477_s14, 1 }
  0x36   : > { %4647 = sst [smem:[#allocation45_spill]] %s4646_s7  ;;  %s59_s7 = sadd.s32 1, %s3477_s14 }
  0x37   : > { %s4753_s7 = smov (!%p57_p6, %s59_s7), %s3477_s14  ;;  %s108_s26 = sadd.s32 1, %s3445_s30 }
  0x38   : > { %p61_p9 = scmp.ge.s32.totalorder %s4753_s7, 3  ;;  %p115_p10 = scmp.ne.s32.totalorder %s3445_s30, %s3441_s29 }
  0x39   : > { %s519_s20 = sshll.u32 %s4645_s12, 4  ;;  %s4582_s12 = smov 1   ;;  %s520_s20 = int_to_ptr.hbm [resolvable:$true] %s519_s20 }
  0x3a   : > { %2703 = dma.hbm_to_vmem [thread:$0]  (!%p3702_p5), %s520_s20, 48, %s522_s5, [#allocation22], %s4581_s21, %s4581_s21, %s4582_s12  }
  0x3b   : > { %s100_s5 = scalar_select %p99_p8, %s3473_s22, 0 }
  0x3c   : > { %s4755_s7 = smov (%p61_p9, %s4753_s7), 0  ;;  %s4757_s2 = smov (!%p61_p9, %s63_s2), %s3481_s16 }
  0x3d   : > { %4650 = sst [smem:[#allocation47_spill]] %s4755_s7  ;;  %p101_p11 = scmp.eq.s32.totalorder %s4755_s7, 1 }
  0x3e   : > { %p3729_p12 = por %p115_p10, %p84_p7  ;;  %p65_p13 = scmp.ge.s32.totalorder %s4757_s2, 2 }
  0x3f   : > { %p121_p0 = scmp.ne.s32.totalorder %s3441_s29, %s3437_s28  ;;  %p4605_p4 = scmp.lt.s32.totalorder %s3485_s11, 12 }
  0x40   : > { %s102_s21 = scalar_select %p101_p11, %s4751_s9, 0 }
  0x41   : > { %s4759_s2 = smov (%p65_p13, %s4757_s2), 0  ;;  %p3740_p2 = por %p121_p0, %p3686_p1 }
  0x42   : > { %4652 = sst [smem:[#allocation48_spill]] %s4759_s2  ;;  %s104_s12 = ssub.s32 %s100_s5, %s102_s21 }
  0x43   : > { %s4653_s15 = scalar_select %p3740_p2, 1, 0 }
  0x44   : > { %s3746_s27 = ssub.s32 %s3481_s16, %s4759_s2  ;;  %s3751_s0 = sshll.u32 %s3481_s16, 4 }
  0x45   : > { %4654 = sst [smem:[#allocation49_spill]] %s4653_s15  ;;  %s105_s13 = sor.u32 %s104_s12, %s3746_s27 }
  0x46   : > { %p106_p6 = scmp.eq.s32.totalorder %s105_s13, 0  ;;  %s3757_s29 = sand.u32 1, %s3485_s11  }
  0x47   : > { %s583_s21 = sand.u32 1, %s3445_s30   ;;  %s592_s15 = sadd.s32 %s3751_s0, %s100_s5 }
  0x48   : > { %s3754_s28 = scalar_select %p106_p6, %s3445_s30, %s108_s26  }
  0x49   : > { %s2467_s2 = sshll.u32 %s583_s21, 5  ;;  %s2470_s17 = sshll.u32 %s592_s15, 2 }
  0x4a   : > { %4655 = sst [smem:[#allocation50_spill]] %s3754_s28  ;;  %s585_s12 = scalar_lea.vmem [#allocation9], %s2467_s2 }
  0x4b   : > { %s597_s16 = sshll.u32 %s585_s12, 4  ;;  %s4656_s1 = sld [smem:[#allocation57_spill]]  ;;  %s598_s16 = int_to_ptr.vmem [resolvable:$true] %s597_s16 }
  0x4c   : > { %p2711_p8 = pnand %p4605_p4, %p3729_p12  ;;  %s4592_s15 = scalar_lea.sflag [#allocation10], %s3757_s29 }
  0x4d   : > { %s4593_s2 = smov 128   ;;  %s4595_s5 = smov 64  }
  0x4e   : > { %s4597_s21 = smov 4   ;;  %s166_s12 = sadd.s32 1, %s3421_s25 }
  0x4f   : > { %p173_p10 = scmp.ne.s32.totalorder %s3421_s25, %s3417_s24  ;;  %p179_p11 = scmp.ne.s32.totalorder %s3417_s24, %s3413_s23 }
  0x50   : > { %s3793_s13 = sand.u32 1, %s3421_s25   ;;  %s4660_s3 = sld [smem:[#allocation59_spill]] }
  0x51   : > { %s594_s28 = scalar_lea.hbm %s4656_s1, %s2470_s17  ;;  %s163_s17 = ssub.s32 %s3477_s14, %s4755_s7 }
  0x52   : > { %s595_s30 = sshll.u32 %s594_s28, 4  ;;  %p164_p9 = scmp.eq.s32.totalorder %s163_s17, 0  ;;  %s596_s30 = int_to_ptr.hbm [resolvable:$true] %s595_s30 }
  0x53   : > { %2713 = dma.hbm_to_vmem [thread:$0]  (!%p2711_p8), %s596_s30, 512, %s598_s16, %s4592_s15, %s4593_s2, %s4595_s5, %s4597_s21  }
  0x54   : > { %s3782_s20 = scalar_select %p164_p9, %s3421_s25, %s166_s12  }
  0x55   : > { %p175_p12 = por %p173_p10, %p84_p7  ;;  %p3788_p13 = por %p179_p11, %p3686_p1 }
  0x56   : > { %4657 = sst [smem:[#allocation51_spill]] %s3782_s20  ;;  %s2631_s16 = sshll.u32 %s3477_s14, 6 }
  0x57   : > { %s4658_s28 = scalar_select %p3788_p13, 1, 0 }
  0x58   : > { %s2475_s30 = sshll.u32 %s3793_s13, 6  ;;  %s642_s23 = scalar_lea.hbm %s4660_s3, %s2631_s16 }
  0x59   : > { %4659 = sst [smem:[#allocation52_spill]] %s4658_s28  ;;  %s643_s12 = sshll.u32 %s642_s23, 4  ;;  %s644_s12 = int_to_ptr.hbm [resolvable:$true] %s643_s12 }
  0x5a   : > { %s637_s15 = scalar_lea.vmem [#allocation12], %s2475_s30  ;;  %p3802_p0 = pnand %p4605_p4, %p175_p12 }
  0x5b   : > { %s645_s2 = sshll.u32 %s637_s15, 4  ;;  %s4663_s10 = sld [smem:[#allocation66_spill]]  ;;  %s646_s2 = int_to_ptr.vmem [resolvable:$true] %s645_s2 }
  0x5c   : > { %s4661_s5 = scalar_select %p3802_p0, 1, 0 }
  0x5d   : > { %s4603_s23 = scalar_lea.sflag [#allocation13], %s3757_s29  ;;  %s4664_s15 = smov 4  }
  0x5e   : > { %4662 = sst [smem:[#allocation53_spill]] %s4661_s5  ;;  %s4665_s3 = smov 64  }
  0x5f   : > { %2719 = dma.hbm_to_vmem [thread:$0]  (!%p3802_p0), %s644_s12, 1024, %s646_s2, %s4603_s23, %s4665_s3, %s4665_s3, %s4664_s15  }
  0x60   : > { %s745_s20 = scalar_lea.vmem [#allocation20], %s2475_s30  ;;  %s4668_s6 = sld [smem:[#allocation62_spill]] }
  0x61   : > { %s750_s26 = scalar_lea.hbm %s4663_s10, %s2631_s16  ;;  %s753_s25 = sshll.u32 %s745_s20, 4  ;;  %s3819_s25 = int_to_ptr.vmem [resolvable:$true] %s753_s25 }
  0x62   : > { %s751_s17 = sshll.u32 %s750_s26, 4  ;;  %4667 = sst [smem:[#allocation55_spill]] %s3819_s25  ;;  %s3817_s17 = int_to_ptr.hbm [resolvable:$true] %s751_s17 }
  0x63   : > { %4666 = sst [smem:[#allocation54_spill]] %s3817_s17  ;;  %s681_s10 = scalar_lea.vmem [#allocation15], %s3793_s13 }
  0x64   : > { %s688_s28 = sshll.u32 %s681_s10, 4  ;;  %s4604_s24 = scalar_lea.sflag [#allocation16], %s3757_s29  ;;  %s689_s28 = int_to_ptr.vmem [resolvable:$true] %s688_s28 }
  0x65   : > { %s2478_s2 = sshll.u32 %s3793_s13, 7  ;;  %s2632_s20 = sshll.u32 %s3477_s14, 7 }
  0x66   : > { %s684_s16 = scalar_lea.hbm %s4668_s6, %s3477_s14  ;;  %s4669_s8 = sld [smem:[#allocation64_spill]] }
  0x67   : > { %s686_s26 = sshll.u32 %s684_s16, 4  ;;  %s716_s21 = scalar_lea.vmem [#allocation18], %s2478_s2  ;;  %s687_s26 = int_to_ptr.hbm [resolvable:$true] %s686_s26 }
  0x68   : > { %2725 = dma.hbm_to_vmem [thread:$0]  (!%p3802_p0), %s687_s26, 16, %s689_s28, %s4604_s24  }
  0x69   : > { %s724_s16 = sshll.u32 %s716_s21, 4  ;;  %s4670_s23 = sld [smem:[#allocation39_spill]]  ;;  %s725_s16 = int_to_ptr.vmem [resolvable:$true] %s724_s16 }
  0x6a   : > { %s4671_s28 = sld [smem:[#allocation38_spill]]  ;;  %s4606_s26 = scalar_lea.sflag [#allocation19], %s3757_s29 }
  0x6b   : > { %s3493_s24 = smov 8   ;;  %s4672_s6 = smov 128  }
  0x6c   : > { %s721_s1 = scalar_lea.hbm %s4669_s8, %s2632_s20  ;;  %s4673_s30 = sld [smem:[#allocation69_spill]] }
  0x6d   : > { %s722_s10 = sshll.u32 %s721_s1, 4  ;;  %s3494_s1 = smov [#allocation23]   ;;  %s723_s10 = int_to_ptr.hbm [resolvable:$true] %s722_s10 }
  0x6e   : > { %2731 = dma.hbm_to_vmem [thread:$0]  (!%p3802_p0), %s723_s10, 2048, %s725_s16, %s4606_s26, %s4672_s6, %s4672_s6, %s3493_s24  }
  0x6f   : > { %s535_s21 = sshll.u32 %s3494_s1, 4  ;;  %s4674_s8 = smov 1   ;;  %s536_s21 = int_to_ptr.vmem [resolvable:$true] %s535_s21 }
  0x70   : > { %s4675_s17 = smov 16   ;;  %p67_p6 = scmp.eq.s32.totalorder %s3477_s14, 0 }
  0x71   : > { %p69_p8 = scmp.eq.s32.totalorder %s4755_s7, 0  ;;  %s76_s24 = sadd.s32 1, %s3457_s18 }
  0x72   : > { %s533_s12 = sshll.u32 %s4673_s30, 4  ;;  %p83_p9 = scmp.ne.s32.totalorder %s3457_s18, %s4670_s23  ;;  %s534_s12 = int_to_ptr.hbm [resolvable:$true] %s533_s12 }
  0x73   : > { %2706 = dma.hbm_to_vmem [thread:$0]  (!%p3702_p5), %s534_s12, 48, %s536_s21, [#allocation22], %s4675_s17, %s4675_s17, %s4674_s8  }
  0x74   : > { %s68_s16 = scalar_select %p67_p6, %s3473_s22, 0 }
  0x75   : > { %s70_s10 = scalar_select %p69_p8, %s4751_s9, 0 }
  0x76   : > { %p89_p10 = scmp.ne.s32.totalorder %s4670_s23, %s4671_s28  ;;  %s555_s20 = sand.u32 1, %s3457_s18  }
  0x77   : > { %s72_s2 = ssub.s32 %s68_s16, %s70_s10  ;;  %p85_p11 = por %p84_p7, %p83_p9 }
  0x78   : > { %s73_s30 = sor.u32 %s72_s2, %s3746_s27  ;;  %p3866_p4 = por %p3686_p1, %p89_p10 }
  0x79   : > { %p74_p12 = scmp.eq.s32.totalorder %s73_s30, 0  ;;  %s4678_s4 = sld [smem:[#allocation35_spill]] }
  0x7a   : > { %s4676_s8 = scalar_select %p3866_p4, 1, 0 }
  0x7b   : > { %s2463_s17 = sshll.u32 %s555_s20, 5  ;;  %s4679_s12 = sld [smem:[#allocation34_spill]] }
  0x7c   : > { %4677 = sst [smem:[#allocation38_spill]] %s4676_s8  ;;  %s566_s23 = sadd.s32 %s3751_s0, %s68_s16 }
  0x7d   : > { %s3871_s1 = scalar_select %p74_p12, %s3457_s18, %s76_s24  }
  0x7e   : > { %s2466_s28 = sshll.u32 %s566_s23, 2  ;;  %s559_s21 = scalar_lea.vmem [#allocation7], %s2463_s17 }
  0x7f   : > { %s4680_s10 = sld [smem:[#allocation33_spill]]  ;;  %s571_s2 = sshll.u32 %s559_s21, 4  ;;  %s572_s2 = int_to_ptr.vmem [resolvable:$true] %s571_s2 }
  0x80   : > { %s4681_s25 = sld [smem:[#allocation56_spill]]  ;;  %p4682_p5 = scmp.lt.s32.totalorder %s3485_s11, 12 }
  0x81   : > { %s556_s24 = scalar_lea.sflag [#allocation8], %s555_s20  ;;  %p131_p8 = scmp.eq.s32.totalorder %s3477_s14, 2 }
  0x82   : > { %p2708_p6 = pnand %p4682_p5, %p85_p11  ;;  %p133_p9 = scmp.eq.s32.totalorder %s4755_s7, 2 }
  0x83   : > { %s140_s16 = sadd.s32 1, %s4678_s4  ;;  %p147_p10 = scmp.ne.s32.totalorder %s4678_s4, %s4679_s12 }
  0x84   : > { %s134_s26 = scalar_select %p133_p9, %s4751_s9, 0 }
  0x85   : > { %p3891_p12 = por %p147_p10, %p84_p7  ;;  %p153_p11 = scmp.ne.s32.totalorder %s4679_s12, %s4680_s10 }
  0x86   : > { %s568_s5 = scalar_lea.hbm %s4681_s25, %s2466_s28  ;;  %s609_s17 = sand.u32 1, %s4678_s4  }
  0x87   : > { %s569_s8 = sshll.u32 %s568_s5, 4  ;;  %p3901_p5 = por %p153_p11, %p3686_p1  ;;  %s570_s8 = int_to_ptr.hbm [resolvable:$true] %s569_s8 }
  0x88   : > { %2710 = dma.hbm_to_vmem [thread:$0]  (!%p2708_p6), %s570_s8, 512, %s572_s2, %s556_s24, %s4672_s6, %s4665_s3, %s4664_s15  }
  0x89   : > { %s132_s25 = scalar_select %p131_p8, %s3473_s22, 0 }
  0x8a   : > { %s2471_s28 = sshll.u32 %s609_s17, 5  ;;  %p4687_p7 = scmp.lt.s32.totalorder %s3485_s11, 12 }
  0x8b   : > { %s136_s20 = ssub.s32 %s132_s25, %s134_s26  ;;  %s618_s21 = sadd.s32 %s3751_s0, %s132_s25 }
  0x8c   : > { %s137_s8 = sor.u32 %s136_s20, %s3746_s27  ;;  %s2474_s30 = sshll.u32 %s618_s21, 2 }
  0x8d   : > { %p138_p6 = scmp.eq.s32.totalorder %s137_s8, 0  ;;  %s611_s12 = scalar_lea.vmem [#allocation11], %s2471_s28 }
  0x8e   : > { %s623_s10 = sshll.u32 %s611_s12, 4  ;;  %s4686_s27 = sld [smem:[#allocation58_spill]]  ;;  %s624_s10 = int_to_ptr.vmem [resolvable:$true] %s623_s10 }
  0x8f   : > { %s4761_s4 = smov (!%p138_p6, %s4678_s4), %s140_s16  ;;  %p2714_p8 = pnand %p4687_p7, %p3891_p12 }
  0x90   : > { %s4688_s25 = sld [smem:[#allocation61_spill]]  ;;  %s4691_s21 = scalar_lea.sflag [#allocation10], %s3757_s29 }
  0x91   : > { %s4689_s17 = sld [smem:[#allocation55_spill]]  ;;  %s664_s5 = scalar_lea.vmem [#allocation14], %s3793_s13 }
  0x92   : > { %s4690_s8 = sld [smem:[#allocation54_spill]]  ;;  %s671_s12 = sshll.u32 %s664_s5, 4  ;;  %s672_s12 = int_to_ptr.vmem [resolvable:$true] %s671_s12 }
  0x93   : > { %s4692_s24 = scalar_lea.sflag [#allocation13], %s3757_s29  ;;  %s698_s9 = scalar_lea.vmem [#allocation17], %s3793_s13 }
  0x94   : > { %s620_s20 = scalar_lea.hbm %s4686_s27, %s2474_s30  ;;  %s4694_s22 = scalar_lea.sflag [#allocation16], %s3757_s29 }
  0x95   : > { %s621_s7 = sshll.u32 %s620_s20, 4  ;;  %s4693_s20 = sld [smem:[#allocation63_spill]]  ;;  %s622_s7 = int_to_ptr.hbm [resolvable:$true] %s621_s7 }
  0x96   : > { %s667_s28 = scalar_lea.hbm %s4688_s25, %s3477_s14  ;;  %s705_s25 = sshll.u32 %s698_s9, 4  ;;  %s706_s25 = int_to_ptr.vmem [resolvable:$true] %s705_s25 }
  0x97   : > { %2716 = dma.hbm_to_vmem [thread:$0]  (!%p2714_p8), %s622_s7, 512, %s624_s10, %s4691_s21, %s4672_s6, %s4665_s3, %s4664_s15  }
  0x98   : > { %s669_s30 = sshll.u32 %s667_s28, 4  ;;  %s4695_s6 = scalar_lea.sflag [#allocation19], %s3757_s29  ;;  %s670_s30 = int_to_ptr.hbm [resolvable:$true] %s669_s30 }
  0x99   : > { %2722 = dma.hbm_to_vmem [thread:$0]  (!%p3802_p0), %s670_s30, 16, %s672_s12, %s4692_s24  }
  0x9a   : > { %2734 = dma.hbm_to_vmem [thread:$0]  (!%p3802_p0), %s4690_s8, 1024, %s4689_s17, %s4695_s6, %s4665_s3, %s4665_s3, %s4664_s15  }
  0x9b   : > { %s701_s0 = scalar_lea.hbm %s4693_s20, %s3477_s14  ;;  %771 = sbr.rel (%p3694_p3) target bundleno = 1830 (0x726), region = 84 }
  0x9c   : > { %s703_s16 = sshll.u32 %s701_s0, 4  ;;  %s4697_s10 = sld [smem:[#allocation39_spill]] (!%p3694_p3)  ;;  %s704_s16 = int_to_ptr.hbm [resolvable:$true] %s703_s16 }
  0x9d   : > { %2728 = dma.hbm_to_vmem [thread:$0]  (!%p3802_p0), %s704_s16, 16, %s706_s25, %s4694_s22  }
  0xa2   : > { %s773_s21 = sand.u32 1, %s4697_s10  }
  0xa3   : > { %s2485_s30 = sshll.u32 %s773_s21, 5  ;;  %s774_s13 = scalar_lea.sflag [#allocation8], %s773_s21 }
  0xa4   : > { %s3951_s9 = scalar_lea.vmem [#allocation7], %s2485_s30 }
  0xa5   : > { %3384 = dma.done.wait (%p3866_p4), %s774_s13, 512  }
  0xa6   : > { %3386 = vsyncadd (%p3866_p4), %s774_s13, 4294966784  ;;  %s4699_s22 = sadd.s32 4294967295, %s3485_s11   ;;  %s4700_s2 = sld [smem:[#allocation36_spill]] }
  0xa7   : > { %s783_s3 = sand.u32 1, %s4699_s22  }
  0xa8   : > { %s784_s8 = scalar_lea.sflag [#allocation10], %s783_s3 }
  0xac   : > { %s785_s15 = sand.u32 1, %s4700_s2  }
  0xad   : > { %s2486_s17 = sshll.u32 %s785_s15, 5 }
  0xae   : > { %s3960_s5 = scalar_lea.vmem [#allocation9], %s2486_s17 }
  0xaf   : > { %3388 = dma.done.wait (%p3740_p2), %s784_s8, 512  }
  0xb0   : > { %3390 = vsyncadd (%p3740_p2), %s784_s8, 4294966784  ;;  %s4702_s12 = sld [smem:[#allocation34_spill]] }
  0xb6   : > { %s795_s24 = sand.u32 1, %s4702_s12  }
  0xb7   : > { %s2487_s26 = sshll.u32 %s795_s24, 5 }
  0xb8   : > { %s3967_s27 = scalar_lea.vmem [#allocation11], %s2487_s26 }
  0xb9   : > { %3392 = dma.done.wait (%p3901_p5), %s784_s8, 512  }
  0xba   : > { %3394 = vsyncadd (%p3901_p5), %s784_s8, 4294966784  ;;  %s4703_s20 = sld [smem:[#allocation31_spill]]  ;;  %s804_s6 = scalar_lea.sflag [#allocation13], %s783_s3 }
  0xc0   : > { %s3974_s16 = sand.u32 1, %s4703_s20  }
  0xc1   : > { %s2488_s25 = sshll.u32 %s3974_s16, 6 }
  0xc2   : > { %s3977_s7 = scalar_lea.vmem [#allocation12], %s2488_s25 }
  0xc3   : > { %3396 = dma.done.wait (%p3788_p13), %s804_s6, 1040  }
  0xc4   : > { %3398 = vsyncadd (%p3788_p13), %s804_s6, 4294966256  ;;  %s816_s10 = scalar_lea.vmem [#allocation14], %s3974_s16  ;;  %s823_s23 = scalar_lea.sflag [#allocation16], %s783_s3 }
  0xc5   : > { %s825_s28 = scalar_lea.vmem [#allocation15], %s3974_s16 }
  0xc6   : > { %3400 = dma.done.wait (%p3788_p13), %s823_s23, 32  }
  0xc7   : > { %3402 = vsyncadd (%p3788_p13), %s823_s23, 4294967264  ;;  %s2489_s21 = sshll.u32 %s3974_s16, 7  ;;  %s834_s30 = scalar_lea.vmem [#allocation17], %s3974_s16 }
  0xc8   : > { %s841_s13 = scalar_lea.sflag [#allocation19], %s783_s3  ;;  %s3991_s22 = scalar_lea.vmem [#allocation18], %s2489_s21 }
  0xc9   : > { %3404 = dma.done.wait (%p3788_p13), %s841_s13, 3072  }
  0xca   : > { %3406 = vsyncadd (%p3788_p13), %s841_s13, 4294964224  ;;  %s3997_s2 = scalar_lea.vmem [#allocation20], %s2488_s25 }
  0xcb   : > { %3408 = dma.done.wait (%p3686_p1), [#allocation22], 96  }
  0xcc   : > { %3410 = vsyncadd (%p3686_p1), [#allocation22], 4294967200  ;;  %s4705_s29 = sld [smem:[#allocation41_spill]]  ;;  %v984_v4 = vld [vmem:[%s3951_s9] sm:$0xf] }
  0xcd   : > { %s4706_s3 = sld [smem:[#allocation42_spill]]  ;;  %v993_v5 = vld [vmem:[%s3960_s5] sm:$0xf]  ;;  %v985_v7 = vld [vmem:[%s3951_s9 + $0x4] sm:$0xf] }
  0xce   : > { %s4707_s12 = sld [smem:[#allocation60_spill]]  ;;  %v994_v8 = vld [vmem:[%s3960_s5 + $0x4] sm:$0xf]  ;;  %v995_v9 = vld [vmem:[%s3960_s5 + $0x8] sm:$0xf] }
  0xcf   : > { %s4708_s25 = sld [smem:[#allocation65_spill]]  ;;  %v996_v10 = vld [vmem:[%s3960_s5 + $0xc] sm:$0xf]  ;;  %v986_v11 = vld [vmem:[%s3951_s9 + $0x8] sm:$0xf] }
  0xd0   : > { %s4709_s13 = sld [smem:[#allocation67_spill]]  ;;  %v987_v12 = vld [vmem:[%s3951_s9 + $0xc] sm:$0xf]  ;;  %v988_v13 = vld [vmem:[%s3951_s9 + $0x10] sm:$0xf] }
  0xd1   : > { %v989_v14 = vld [vmem:[%s3951_s9 + $0x14] sm:$0xf]  ;;  %v997_v15 = vld [vmem:[%s3960_s5 + $0x10] sm:$0xf]  ;;  %v999_v17 = vld [vmem:[%s3960_s5 + $0x18] sm:$0xf] }
  0xd2   : > { %p983_p3 = scmp.eq.s32.totalorder %s4705_s29, 0  ;;  %p992_p2 = scmp.eq.s32.totalorder %s4705_s29, 1  ;;  %v998_v16 = vld [vmem:[%s3960_s5 + $0x14] sm:$0xf]  ;;  %v990_v18 = vld [vmem:[%s3951_s9 + $0x18] sm:$0xf] }
  0xd3   : > { %p969_p4 = scmp.lt.s32.totalorder %s4705_s29, 2  ;;  %p979_p1 = scmp.lt.s32.totalorder %s4706_s3, 1  ;;  %v991_v19 = vld [vmem:[%s3951_s9 + $0x1c] sm:$0xf]  ;;  %v1001_v21 = vld [vmem:[%s3967_s27] sm:$0xf] }
  0xd4   : > { %s1009_s15 = scalar_select %p992_p2, 1, 0  ;;  %v1000_v20 = vld [vmem:[%s3960_s5 + $0x1c] sm:$0xf]  ;;  %v1002_v22 = vld [vmem:[%s3967_s27 + $0x4] sm:$0xf] }
  0xd5   : > { %s1020_s17 = scalar_select %p983_p3, 1, 0  ;;  %v1003_v23 = vld [vmem:[%s3967_s27 + $0x8] sm:$0xf]  ;;  %v1004_v24 = vld [vmem:[%s3967_s27 + $0xc] sm:$0xf] }
  0xd6   : > { %s4763_s29 = smov (!%p969_p4, %s4705_s29), 2  ;;  %v1010_v1 = vstv %s1009_s15  ;;  %s4765_s3 = smov (!%p979_p1, %s4706_s3), 1  ;;  %v1005_v25 = vld [vmem:[%s3967_s27 + $0x10] sm:$0xf]  ;;  %v1006_v28 = vld [vmem:[%s3967_s27 + $0x14] sm:$0xf] }
  0xd7   : > { %v1021_v2 = vstv %s1020_s17  ;;  %s971_s24 = scalar_lea.vmem %s4707_s12, %s4763_s29  ;;  %s2493_s26 = sshll.u32 %s4763_s29, 1  ;;  %vm4024_vm0 = vcmp.eq.s32.totalorder %v1010_v1, 1  ;;  %v1007_v29 = vld [vmem:[%s3967_s27 + $0x18] sm:$0xf]  ;;  %v1008_v30 = vld [vmem:[%s3967_s27 + $0x1c] sm:$0xf] }
  0xd8   : > { %s4018_s6 = scalar_lea.vmem %s4708_s25, %s2493_s26  ;;  %s978_s15 = scalar_lea.vmem %s4709_s13, %s4763_s29  ;;  %vm4030_vm1 = vcmp.eq.s32.totalorder %v1021_v2, 1  ;;  %v1012_v26 = vsel %vm4024_vm0, %v993_v5, %v1001_v21  ;;  %v1013_v27 = vsel %vm4024_vm0, %v994_v8, %v1002_v22  ;;  %v1014_v31 = vsel %vm4024_vm0, %v995_v9, %v1003_v23 }
  0xd9   : > { %v1015_v32 = vsel %vm4024_vm0, %v996_v10, %v1004_v24  ;;  %v1016_v33 = vsel %vm4024_vm0, %v997_v15, %v1005_v25  ;;  %v1023_v34 = vsel %vm4030_vm1, %v984_v4, %v1012_v26  ;;  %v1017_v35 = vsel %vm4024_vm0, %v998_v16, %v1006_v28  ;;  %s2494_s9 = sshll.u32 %s4765_s3, 3  ;;  %s4714_s17 = sld [smem:[#allocation71_spill]] }
  0xda   : > { %v1018_v36 = vsel %vm4024_vm0, %v999_v17, %v1007_v29  ;;  %v1019_v37 = vsel %vm4024_vm0, %v1000_v20, %v1008_v30  ;;  %v4079_v38 = vsel %vm4030_vm1, %v985_v7, %v1013_v27  ;;  %v1025_v39 = vsel %vm4030_vm1, %v986_v11, %v1014_v31  ;;  %s4715_s3 = sld [smem:[#allocation40_spill]] }
  0xdb   : > { %v1026_v40 = vsel %vm4030_vm1, %v987_v12, %v1015_v32  ;;  %v4088_v41 = vsel %vm4030_vm1, %v988_v13, %v1016_v33  ;;  %v1028_v42 = vsel %vm4030_vm1, %v989_v14, %v1017_v35  ;;  %v4099_v43 = vsel %vm4030_vm1, %v990_v18, %v1018_v36 }
  0xdc   : > { %v4103_v44 = vsel %vm4030_vm1, %v991_v19, %v1019_v37 }
  0xdf   : > { %s4095_s19 = scalar_lea.vmem %s4714_s17, %s2494_s9 }
  0xe0   : > { %p2495_p13 = scmp.ne.s32.totalorder %s4715_s3, 0 }
  0xe2   : > { %1034 = sbr.rel (%p2495_p13) target bundleno = 235 (0xeb), region = 132 }
  0xe7   : > { %v3495_v45 = vmov -1e+30   ;;  %v3496_v46 = vmov 0.0  }
  0xe8   : > { %1035 = vst [vmem:[#allocation2] sm:$0xff] %v3495_v45 }
  0xe9   : > { %1036 = vst [vmem:[#allocation3] sm:$0xff] %v3496_v46 }
  0xea   : > { %1037 = vst [vmem:[#allocation4] sm:$0xff] %v3496_v46 }
  0xeb PF: > { %v1042_v47 = vunpack.c.l.bf16 %v4088_v41  ;;  %v1040_v48 = vunpack.c.l.bf16 %v1025_v39  ;;  %v1038_v49 = vunpack.c.l.bf16 %v1023_v34  ;;  %v1043_v50 = vunpack.c.l.bf16 %v1028_v42  ;;  %v2554_v30 = vld [vmem:[%s3991_s22 + $0x70] sm:$0xf]  ;;  %v2649_v31 = vld [vmem:[%s3991_s22 + $0x74] sm:$0xf0]  ;;  %v2648_v32 = vld [vmem:[%s3991_s22 + $0x74] sm:$0xf] }
  0xec   : > { %v1041_v51 = vunpack.c.l.bf16 %v1026_v40  ;;  %v1039_v52 = vunpack.c.l.bf16 %v4079_v38  ;;  %v1045_v53 = vunpack.c.l.bf16 %v4103_v44  ;;  %v1044_v54 = vunpack.c.l.bf16 %v4099_v43  ;;  %v2556_v34 = vld [vmem:[%s3991_s22 + $0x78] sm:$0xf0]  ;;  %v2546_v36 = vld [vmem:[%s3991_s22 + $0x60] sm:$0xf]  ;;  %v2647_v37 = vld [vmem:[%s3991_s22 + $0x64] sm:$0xf0] }
  0xed   : > { %1056 = vadd.xlane.f32.xlu2 %v1042_v47  ;;  %1052 = vadd.xlane.f32.xlu1 %v1040_v48  ;;  %v3497_v55 = vmov 128.0   ;;  %v2555_v33 = vor.u32 %v2649_v31, %v2554_v30  ;;  %v2559_v35 = vor.u32 %v2648_v32, %v2556_v34  ;;  %v2646_v38 = vld [vmem:[%s3991_s22 + $0x64] sm:$0xf]  ;;  %v2547_v39 = vor.u32 %v2647_v37, %v2546_v36  ;;  %v2548_v40 = vld [vmem:[%s3991_s22 + $0x68] sm:$0xf0]  ;;  %s4723_s16 = sld [smem:[#allocation40_spill]] }
  0xee   : > { %1048 = vadd.xlane.f32.xlu0 %v1038_v49  ;;  %2908 = vrcp.f32 %v3497_v55  ;;  %v2551_v41 = vor.u32 %v2646_v38, %v2548_v40  ;;  %v2538_v42 = vld [vmem:[%s3991_s22 + $0x50] sm:$0xf]  ;;  %v2645_v43 = vld [vmem:[%s3991_s22 + $0x54] sm:$0xf0]  ;;  %v2644_v44 = vld [vmem:[%s3991_s22 + $0x54] sm:$0xf] }
  0xef   : > { %1343 = vmatpush.bf16.msra.mxu0 %v2555_v33  ;;  %2666 = vmatpush.bf16.msra.mxu3 %v2555_v33  ;;  %v2539_v45 = vor.u32 %v2645_v43, %v2538_v42  ;;  %v2540_v46 = vld [vmem:[%s3991_s22 + $0x58] sm:$0xf0]  ;;  %v2641_v55 = vld [vmem:[%s3991_s22 + $0x34] sm:$0xf0] }
  0xf0   : > { %1372 = vmatpush.bf16.msra.mxu1 %v2559_v35 }
  0xf3   : > { %1344 = vmatpush.bf16.msra.mxu0 %v2547_v39  ;;  %2667 = vmatpush.bf16.msra.mxu3 %v2547_v39  ;;  %p1951_p0 = scmp.eq.s32.totalorder %s4723_s16, 1  ;;  %p2592_p9 = scmp.ne.s32.totalorder %s4723_s16, 1 }
  0xf4   : > { %v2909_v56 = vpop.eup %2908  ;;  %1373 = vmatpush.bf16.msra.mxu1 %v2551_v41 }
  0xf5   : > { %1058 = vadd.xlane.f32.xlu2 %v1043_v50  ;;  %1054 = vadd.xlane.f32.xlu1 %v1041_v51  ;;  %v1065_v57 = vmul.f32 128.0, %v2909_v56  ;;  %vm1069_vm2 = vweird.f32 %v2909_v56 }
  0xf6   : > { %1050 = vadd.xlane.f32.xlu0 %v1039_v52 }
  0xf7   : > { %v1066_v58 = vsub.f32 1.0, %v1065_v57  ;;  %1345 = vmatpush.bf16.msra.mxu0 %v2539_v45  ;;  %2668 = vmatpush.bf16.msra.mxu3 %v2539_v45 }
  0xf9   : > { %v1067_v59 = vmul.f32 %v2909_v56, %v1066_v58  ;;  %v2524_v58 = vld [vmem:[%s3991_s22 + $0x38] sm:$0xf0] }
  0xfb   : > { %v1068_v60 = vadd.f32 %v2909_v56, %v1067_v59 }
  0xfd   : > { %1062 = vadd.xlane.f32.xlu1 %v1045_v53  ;;  %v4110_v61 = vsel %vm1069_vm2, %v2909_v56, %v1068_v60  ;;  %v2640_v56 = vld [vmem:[%s3991_s22 + $0x34] sm:$0xf]  ;;  %v2514_v60 = vld [vmem:[%s3991_s22 + $0x20] sm:$0xf] }
  0xfe   : > { %1060 = vadd.xlane.f32.xlu0 %v1044_v54  ;;  %v2527_v59 = vor.u32 %v2640_v56, %v2524_v58 }
 0x160   : > { %v1057_v62 = vpop.xlane.xlu2 %1056  ;;  %v1053_v63 = vpop.xlane.xlu1 %1052 }
 0x161   : > { %v1073_v0 = vmul.f32 %v4110_v61, %v1053_v63  ;;  %v1049_v1 = vpop.xlane.xlu0 %1048  ;;  %v1075_v15 = vmul.f32 %v4110_v61, %v1057_v62  ;;  %v2639_v62 = vld [vmem:[%s3991_s22 + $0x24] sm:$0xf0]  ;;  %v2638_v63 = vld [vmem:[%s3991_s22 + $0x24] sm:$0xf] }
 0x162   : > { %v1071_v2 = vmul.f32 %v4110_v61, %v1049_v1  ;;  %v2516_v1 = vld [vmem:[%s3991_s22 + $0x28] sm:$0xf0] }
 0x163   : > { %v4114_v3 = vsub.f32 %v1040_v48, %v1073_v0  ;;  %v4138_v20 = vsub.f32 %v1042_v47, %v1075_v15  ;;  %v2543_v47 = vor.u32 %v2644_v44, %v2540_v46  ;;  %v2530_v48 = vld [vmem:[%s3991_s22 + $0x40] sm:$0xf]  ;;  %v2515_v0 = vor.u32 %v2639_v62, %v2514_v60 }
 0x164   : > { %v4116_v4 = vsub.f32 %v1038_v49, %v1071_v2  ;;  %v2643_v49 = vld [vmem:[%s3991_s22 + $0x44] sm:$0xf0]  ;;  %v2519_v2 = vor.u32 %v2638_v63, %v2516_v1 }
 0x165   : > { %v1089_v5 = vmul.f32 %v4114_v3, %v4114_v3  ;;  %v1091_v25 = vmul.f32 %v4138_v20, %v4138_v20  ;;  %1374 = vmatpush.bf16.msra.mxu1 %v2543_v47 }
 0x166   : > { %v1087_v6 = vmul.f32 %v4116_v4, %v4116_v4 }
 0x167   : > { %1099 = vadd.xlane.f32.xlu1 %v1089_v5  ;;  %v2506_v5 = vld [vmem:[%s3991_s22 + $0x10] sm:$0xf] }
 0x168   : > { %1095 = vadd.xlane.f32.xlu2 %v1087_v6  ;;  %v1059_v7 = vpop.xlane.xlu2 %1058  ;;  %v1055_v8 = vpop.xlane.xlu1 %1054  ;;  %v2637_v6 = vld [vmem:[%s3991_s22 + $0x14] sm:$0xf0] }
 0x169   : > { %v1076_v9 = vmul.f32 %v4110_v61, %v1059_v7  ;;  %v1074_v10 = vmul.f32 %v4110_v61, %v1055_v8  ;;  %v1051_v11 = vpop.xlane.xlu0 %1050  ;;  %v2636_v7 = vld [vmem:[%s3991_s22 + $0x14] sm:$0xf] }
 0x16a   : > { %v1072_v12 = vmul.f32 %v4110_v61, %v1051_v11 }
 0x16b   : > { %v4125_v13 = vsub.f32 %v1043_v50, %v1076_v9  ;;  %v4127_v14 = vsub.f32 %v1041_v51, %v1074_v10  ;;  %v2642_v50 = vld [vmem:[%s3991_s22 + $0x44] sm:$0xf]  ;;  %v2531_v51 = vor.u32 %v2643_v49, %v2530_v48  ;;  %v2507_v9 = vor.u32 %v2637_v6, %v2506_v5  ;;  %v2508_v10 = vld [vmem:[%s3991_s22 + $0x18] sm:$0xf0] }
 0x16c   : > { %v4130_v16 = vsub.f32 %v1039_v52, %v1072_v12  ;;  %v2532_v52 = vld [vmem:[%s3991_s22 + $0x48] sm:$0xf0]  ;;  %v2511_v15 = vor.u32 %v2636_v7, %v2508_v10 }
 0x16d   : > { %v1092_v17 = vmul.f32 %v4125_v13, %v4125_v13  ;;  %v1090_v18 = vmul.f32 %v4127_v14, %v4127_v14  ;;  %1346 = vmatpush.bf16.msra.mxu0 %v2531_v51  ;;  %2669 = vmatpush.bf16.msra.mxu3 %v2531_v51 }
 0x16e   : > { %v1088_v19 = vmul.f32 %v4130_v16, %v4130_v16 }
 0x16f   : > { %1105 = vadd.xlane.f32.xlu1 %v1092_v17 }
 0x170   : > { %1101 = vadd.xlane.f32.xlu2 %v1090_v18  ;;  %1097 = vadd.xlane.f32.xlu0 %v1088_v19  ;;  %v1063_v22 = vpop.xlane.xlu1 %1062  ;;  %v2498_v19 = vld [vmem:[%s3991_s22] sm:$0xf] }
 0x171   : > { %v1061_v21 = vpop.xlane.xlu0 %1060  ;;  %v1078_v26 = vmul.f32 %v4110_v61, %v1063_v22 }
 0x172   : > { %v1077_v23 = vmul.f32 %v4110_v61, %v1061_v21  ;;  %v2635_v21 = vld [vmem:[%s3991_s22 + $0x4] sm:$0xf0] }
 0x173   : > { %v4148_v28 = vsub.f32 %v1045_v53, %v1078_v26  ;;  %v2535_v53 = vor.u32 %v2642_v50, %v2532_v52  ;;  %v2500_v26 = vld [vmem:[%s3991_s22 + $0x8] sm:$0xf0] }
 0x174   : > { %v4141_v24 = vsub.f32 %v1044_v54, %v1077_v23  ;;  %v2522_v54 = vld [vmem:[%s3991_s22 + $0x30] sm:$0xf]  ;;  %v2499_v23 = vor.u32 %v2635_v21, %v2498_v19  ;;  %v4226_v21 = vld [vmem:[%s971_s24] ss:$0 sm:$0xff] }
 0x175   : > { %v1094_v29 = vmul.f32 %v4148_v28, %v4148_v28  ;;  %1375 = vmatpush.bf16.msra.mxu1 %v2535_v53  ;;  %v2523_v57 = vor.u32 %v2641_v55, %v2522_v54 }
 0x176   : > { %v1093_v27 = vmul.f32 %v4141_v24, %v4141_v24 }
 0x177   : > { %1347 = vmatpush.bf16.msra.mxu0 %v2523_v57  ;;  %2670 = vmatpush.bf16.msra.mxu3 %v2523_v57 }
 0x178   : > { %1103 = vadd.xlane.f32.xlu0 %v1091_v25  ;;  %1107 = vadd.xlane.f32.xlu2 %v1093_v27  ;;  %v2634_v25 = vld [vmem:[%s3991_s22 + $0x4] sm:$0xf] }
 0x179   : > { %1376 = vmatpush.bf16.msra.mxu1 %v2527_v59  ;;  %v2503_v27 = vor.u32 %v2634_v25, %v2500_v26 }
 0x17b   : > { %1348 = vmatpush.bf16.msra.mxu0 %v2515_v0  ;;  %2671 = vmatpush.bf16.msra.mxu3 %v2515_v0 }
 0x17d   : > { %1377 = vmatpush.bf16.msra.mxu1 %v2519_v2 }
 0x17f   : > { %1349 = vmatpush.bf16.msra.mxu0 %v2507_v9  ;;  %2672 = vmatpush.bf16.msra.mxu3 %v2507_v9 }
 0x180   : > { %1109 = vadd.xlane.f32.xlu0 %v1094_v29 }
 0x181   : > { %1378 = vmatpush.bf16.msra.mxu1 %v2511_v15 }
 0x183   : > { %1350 = vmatpush.bf16.msra.mxu0 %v2499_v23  ;;  %2673 = vmatpush.bf16.msra.mxu3 %v2499_v23 }
 0x185   : > { %1379 = vmatpush.bf16.msra.mxu1 %v2503_v27 }
 0x1da   : > { %v1100_v8 = vpop.xlane.xlu1 %1099 }
 0x1db   : > { %v1113_v11 = vmul.f32 %v1100_v8, %v4110_v61  ;;  %v1096_v12 = vpop.xlane.xlu2 %1095 }
 0x1dc   : > { %v1111_v17 = vmul.f32 %v1096_v12, %v4110_v61 }
 0x1dd   : > { %v1121_v18 = vadd.f32 1e-06, %v1113_v11 }
 0x1de   : > { %v1119_v22 = vadd.f32 1e-06, %v1111_v17  ;;  %v4259_v17 = vld [vmem:[%s4018_s6] sm:$0x3] }
 0x1df   : > { %2910 = vrsqrt.f32 %v1121_v18  ;;  %vm1153_vm3 = vweird.f32 %v1121_v18 }
 0x1e0   : > { %2912 = vrsqrt.f32 %v1119_v22  ;;  %vm1133_vm7 = vweird.f32 %v1119_v22 }
 0x1e2   : > { %v1106_v29 = vpop.xlane.xlu1 %1105 }
 0x1e3   : > { %v1116_v30 = vmul.f32 %v1106_v29, %v4110_v61  ;;  %v1102_v31 = vpop.xlane.xlu2 %1101  ;;  %v1098_v32 = vpop.xlane.xlu0 %1097 }
 0x1e4   : > { %v1114_v33 = vmul.f32 %v1102_v31, %v4110_v61  ;;  %v1112_v34 = vmul.f32 %v1098_v32, %v4110_v61 }
 0x1e5   : > { %v2911_v35 = vpop.eup %2910  ;;  %v4189_v36 = vadd.f32 1e-06, %v1116_v30 }
 0x1e6   : > { %v2913_v37 = vpop.eup %2912  ;;  %v1148_v38 = vmul.f32 %v2911_v35, %v1121_v18  ;;  %v1122_v39 = vadd.f32 1e-06, %v1114_v33  ;;  %v1120_v40 = vadd.f32 1e-06, %v1112_v34  ;;  %vm1154_vm4 = vweird.f32 %v2911_v35  ;;  %v2905_v34 = vld [vmem:[%s816_s10] ss:$0 sm:$0xff] }
 0x1e7   : > { %v1128_v41 = vmul.f32 %v2913_v37, %v1119_v22  ;;  %2914 = vrsqrt.f32 %v4189_v36  ;;  %vm4198_vm5 = vmor %vm1153_vm3, %vm1154_vm4  ;;  %vm1134_vm6 = vweird.f32 %v2913_v37  ;;  %vm1183_vm1 = vweird.f32 %v4189_v36 }
 0x1e8   : > { %v1149_v42 = vmul.f32 %v2911_v35, %v1148_v38  ;;  %2916 = vrsqrt.f32 %v1122_v39  ;;  %vm4205_vm8 = vmor %vm1133_vm7, %vm1134_vm6  ;;  %vm1163_vm9 = vweird.f32 %v1122_v39  ;;  %vm1143_vm13 = vweird.f32 %v1120_v40 }
 0x1e9   : > { %v1129_v43 = vmul.f32 %v2913_v37, %v1128_v41  ;;  %2918 = vrsqrt.f32 %v1120_v40 }
 0x1ea   : > { %v1150_v44 = vmul.f32 0.5, %v1149_v42 }
 0x1eb   : > { %v1130_v45 = vmul.f32 0.5, %v1129_v43  ;;  %v1108_v46 = vpop.xlane.xlu2 %1107  ;;  %v1104_v47 = vpop.xlane.xlu0 %1103 }
 0x1ec   : > { %v1151_v48 = vsub.f32 1.5, %v1150_v44  ;;  %v1115_v49 = vmul.f32 %v1104_v47, %v4110_v61  ;;  %v1117_v54 = vmul.f32 %v1108_v46, %v4110_v61 }
 0x1ed   : > { %v4193_v50 = vpop.eup %2914  ;;  %v1131_v51 = vsub.f32 1.5, %v1130_v45 }
 0x1ee   : > { %v2917_v52 = vpop.eup %2916  ;;  %v1178_v53 = vmul.f32 %v4193_v50, %v4189_v36  ;;  %v1152_v56 = vmul.f32 %v2911_v35, %v1151_v48  ;;  %v1123_v58 = vadd.f32 1e-06, %v1115_v49  ;;  %v4203_v2 = vadd.f32 1e-06, %v1117_v54 }
 0x1ef   : > { %v2919_v55 = vpop.eup %2918  ;;  %v1158_v57 = vmul.f32 %v2917_v52, %v1122_v39  ;;  %v1132_v60 = vmul.f32 %v2913_v37, %v1131_v51  ;;  %vm1164_vm10 = vweird.f32 %v2917_v52  ;;  %vm1184_vm2 = vweird.f32 %v4193_v50 }
 0x1f0   : > { %v1138_v62 = vmul.f32 %v2919_v55, %v1120_v40  ;;  %v1179_v63 = vmul.f32 %v4193_v50, %v1178_v53  ;;  %2920 = vrsqrt.f32 %v1123_v58  ;;  %v1156_v8 = vsel %vm4198_vm5, %v2911_v35, %v1152_v56  ;;  %vm4214_vm12 = vmor %vm1163_vm9, %vm1164_vm10 }
 0x1f1   : > { %v1159_v0 = vmul.f32 %v2917_v52, %v1158_v57  ;;  %v1136_v11 = vsel %vm4205_vm8, %v2913_v37, %v1132_v60  ;;  %vm1144_vm11 = vweird.f32 %v2919_v55  ;;  %2922 = vrsqrt.f32 %v4203_v2  ;;  %vm1185_vm4 = vmor %vm1183_vm1, %vm1184_vm2 }
 0x1f2   : > { %v1139_v1 = vmul.f32 %v2919_v55, %v1138_v62  ;;  %v1180_v12 = vmul.f32 0.5, %v1179_v63  ;;  %v1209_v22 = vmul.f32 %v1156_v8, %v4114_v3  ;;  %v1207_v26 = vmul.f32 %v1136_v11, %v4116_v4  ;;  %vm1145_vm14 = vmor %vm1143_vm13, %vm1144_vm11 }
 0x1f3   : > { %v1160_v6 = vmul.f32 0.5, %v1159_v0  ;;  %v1110_v7 = vpop.xlane.xlu0 %1109  ;;  %vm1173_vm15 = vweird.f32 %v1123_v58  ;;  %vm1193_vm7 = vweird.f32 %v4203_v2 }
 0x1f4   : > { %v1140_v9 = vmul.f32 0.5, %v1139_v1  ;;  %v1118_v10 = vmul.f32 %v1110_v7, %v4110_v61  ;;  %v1181_v30 = vsub.f32 1.5, %v1180_v12  ;;  %v1220_v35 = vmul.f32 %v4226_v21, %v1209_v22 }
 0x1f5   : > { %v1161_v15 = vsub.f32 1.5, %v1160_v6  ;;  %v1218_v37 = vmul.f32 %v4226_v21, %v1207_v26 }
 0x1f6   : > { %v1141_v18 = vsub.f32 1.5, %v1140_v9  ;;  %v4219_v19 = vadd.f32 1e-06, %v1118_v10  ;;  %v2921_v23 = vpop.eup %2920  ;;  %v1231_v44 = vadd.f32 %v2905_v34, %v1220_v35 }
 0x1f7   : > { %v1162_v25 = vmul.f32 %v2917_v52, %v1161_v15  ;;  %v1168_v29 = vmul.f32 %v2921_v23, %v1123_v58  ;;  %v2923_v38 = vpop.eup %2922  ;;  %vm1174_vm0 = vweird.f32 %v2921_v23  ;;  %v1229_v47 = vadd.f32 %v2905_v34, %v1218_v37 }
 0x1f8   : > { %v1142_v27 = vmul.f32 %v2919_v55, %v1141_v18  ;;  %2924 = vrsqrt.f32 %v4219_v19  ;;  %v1188_v45 = vmul.f32 %v2923_v38, %v4203_v2  ;;  %vm1175_vm3 = vmor %vm1173_vm15, %vm1174_vm0  ;;  %vm1203_vm5 = vweird.f32 %v4219_v19 }
 0x1f9   : > { %v1166_v31 = vsel %vm4214_vm12, %v2917_v52, %v1162_v25  ;;  %v1169_v32 = vmul.f32 %v2921_v23, %v1168_v29  ;;  %vm1194_vm8 = vweird.f32 %v2923_v38  ;;  %v1259_v18 = vperm.slane %v4259_v17, 0 }
 0x1fa   : > { %v1146_v33 = vsel %vm1145_vm14, %v2919_v55, %v1142_v27  ;;  %v1210_v3 = vmul.f32 %v1166_v31, %v4127_v14  ;;  %v1182_v14 = vmul.f32 %v4193_v50, %v1181_v30  ;;  %v1189_v54 = vmul.f32 %v2923_v38, %v1188_v45  ;;  %vm1195_vm10 = vmor %vm1193_vm7, %vm1194_vm8 }
 0x1fb   : > { %v1208_v4 = vmul.f32 %v1146_v33, %v4130_v16  ;;  %v1170_v39 = vmul.f32 0.5, %v1169_v32 }
 0x1fc   : > { %v1221_v40 = vmul.f32 %v4226_v21, %v1210_v3  ;;  %v1186_v55 = vsel %vm1185_vm4, %v4193_v50, %v1182_v14  ;;  %v1190_v59 = vmul.f32 0.5, %v1189_v54 }
 0x1fd   : > { %v1219_v41 = vmul.f32 %v4226_v21, %v1208_v4  ;;  %v1171_v43 = vsub.f32 1.5, %v1170_v39  ;;  %v1212_v58 = vmul.f32 %v1186_v55, %v4125_v13 }
 0x1fe   : > { %v2925_v42 = vpop.eup %2924  ;;  %v1232_v16 = vadd.f32 %v2905_v34, %v1221_v40  ;;  %v1191_v0 = vsub.f32 1.5, %v1190_v59 }
 0x1ff   : > { %v1198_v46 = vmul.f32 %v2925_v42, %v4219_v19  ;;  %v1230_v48 = vadd.f32 %v2905_v34, %v1219_v41  ;;  %v1172_v49 = vmul.f32 %v2921_v23, %v1171_v43  ;;  %v1223_v63 = vmul.f32 %v4226_v21, %v1212_v58 }
 0x200   : > { %v1238_v36 = vpack.c.bf16 %v1232_v16, %v1231_v44  ;;  %vm1204_vm6 = vweird.f32 %v2925_v42  ;;  %v1192_v5 = vmul.f32 %v2923_v38, %v1191_v0  ;;  %v2655_v0 = vld [vmem:[%s3977_s7 + $0x28] sm:$0xff] }
 0x201   : > { %v1199_v51 = vmul.f32 %v2925_v42, %v1198_v46  ;;  %v1237_v52 = vpack.c.bf16 %v1230_v48, %v1229_v47  ;;  %v1176_v53 = vsel %vm1175_vm3, %v2921_v23, %v1172_v49  ;;  %vm1205_vm9 = vmor %vm1203_vm5, %vm1204_vm6 }
 0x202   : > { %1356 = vmatmul.bf16.vlgmr.msra.gmra.mxu3 %v1238_v36  ;;  %v1211_v56 = vmul.f32 %v1176_v53, %v4138_v20  ;;  %v1234_v20 = vadd.f32 %v2905_v34, %v1223_v63  ;;  %v1196_v7 = vsel %vm1195_vm10, %v2923_v38, %v1192_v5  ;;  %v2656_v63 = vld [vmem:[%s3977_s7 + $0x30] sm:$0xff] }
 0x203   : > { %1351 = vmatmul.bf16.vlgmr.msra.gmra.mxu0 %v1237_v52  ;;  %1380 = vmatmul.bf16.vlgmr.msra.gmra.mxu1 %v1237_v52  ;;  %v1200_v57 = vmul.f32 0.5, %v1199_v51  ;;  %v1213_v9 = vmul.f32 %v1196_v7, %v4141_v24 }
 0x204   : > { %v1222_v60 = vmul.f32 %v4226_v21, %v1211_v56 }
 0x205   : > { %v1201_v62 = vsub.f32 1.5, %v1200_v57  ;;  %v1224_v2 = vmul.f32 %v4226_v21, %v1213_v9 }
 0x206   : > { %v1233_v1 = vadd.f32 %v2905_v34, %v1222_v60 }
 0x207   : > { %v1202_v50 = vmul.f32 %v2925_v42, %v1201_v62  ;;  %v1235_v12 = vadd.f32 %v2905_v34, %v1224_v2  ;;  %v2657_v62 = vld [vmem:[%s3977_s7 + $0x38] sm:$0xff] }
 0x208   : > { %v1239_v13 = vpack.c.bf16 %v1234_v20, %v1233_v1  ;;  %1653 = vmatpush.bf16.msra.mxu2 %v2657_v62  ;;  %v2654_v1 = vld [vmem:[%s3977_s7 + $0x20] sm:$0xff]  ;;  %v2652_v20 = vld [vmem:[%s3977_s7 + $0x10] sm:$0xff] }
 0x209   : > { %v1206_v6 = vsel %vm1205_vm9, %v2925_v42, %v1202_v50  ;;  %v2653_v50 = vld [vmem:[%s3977_s7 + $0x18] sm:$0xff] }
 0x20a   : > { %v1214_v8 = vmul.f32 %v1206_v6, %v4148_v28 }
 0x20c   : > { %v1225_v10 = vmul.f32 %v4226_v21, %v1214_v8  ;;  %1654 = vmatpush.bf16.msra.mxu2 %v2656_v63  ;;  %v2650_v8 = vld [vmem:[%s3977_s7] sm:$0xff] }
 0x20e   : > { %v1236_v11 = vadd.f32 %v2905_v34, %v1225_v10 }
 0x210   : > { %v1240_v15 = vpack.c.bf16 %v1236_v11, %v1235_v12  ;;  %1655 = vmatpush.bf16.msra.mxu2 %v2655_v0 }
 0x212   : > { %1361 = vmatmul.bf16.gmra.mxu3 %v1239_v13 }
 0x213   : > { %1385 = vmatmul.bf16.gmra.mxu1 %v1238_v36 }
 0x214   : > { %1656 = vmatpush.bf16.msra.mxu2 %v2654_v1 }
 0x218   : > { %1657 = vmatpush.bf16.msra.mxu2 %v2653_v50 }
 0x21c   : > { %1658 = vmatpush.bf16.msra.mxu2 %v2652_v20 }
 0x222   : > { %1366 = vmatmul.bf16.gmra.mxu3 %v1240_v15 }
 0x223   : > { %1390 = vmatmul.bf16.gmra.mxu1 %v1239_v13  ;;  %v2651_v13 = vld [vmem:[%s3977_s7 + $0x8] sm:$0xff]  ;;  %s4724_s7 = sld [smem:[#allocation41_spill]] (!%p2592_p9) }
 0x224   : > { %1659 = vmatpush.bf16.msra.mxu2 %v2651_v13 }
 0x228   : > { %1660 = vmatpush.bf16.msra.mxu2 %v2650_v8 }
 0x229   : > { %s2625_s24 = sshll.u32 (!%p2592_p9), %s4724_s7, 3 }
 0x22a   : > { %s2055_s26 = scalar_lea.vmem (!%p2592_p9), [#allocation5], %s2625_s24 }
 0x233   : > { %1395 = vmatmul.bf16.gmra.mxu1 %v1240_v15 }
 0x280   : > { %v1352_v19 = vpop.f32.mrf.mxu0 }
 0x281   : > { %v1353_v22 = vadd.f32 %v1352_v19, %v1259_v18 }
 0x283   : > { %1403 = vadd.xlane.f32.xlu1 %v1353_v22 }
 0x285   : > { %v1357_v28 = vpop.f32.mrf.mxu3 }
 0x286   : > { %v1358_v23 = vadd.f32 %v1357_v28, %v1259_v18 }
 0x288   : > { %v1354_v24 = vpop.f32.mrf.mxu0  ;;  %1407 = vadd.xlane.f32.xlu0 %v1358_v23 }
 0x289   : > { %v1355_v25 = vadd.f32 %v1354_v24, %v1259_v18 }
 0x28b   : > { %1405 = vadd.xlane.f32.xlu2 %v1355_v25 }
 0x28d   : > { %v1359_v21 = vpop.f32.mrf.mxu3 }
 0x28e   : > { %v1360_v26 = vadd.f32 %v1359_v21, %v1259_v18 }
 0x290   : > { %1409 = vadd.xlane.f32.xlu1 %v1360_v26 }
 0x295   : > { %v1362_v27 = vpop.f32.mrf.mxu3 }
 0x296   : > { %v1363_v29 = vadd.f32 %v1362_v27, %v1259_v18 }
 0x298   : > { %1411 = vadd.xlane.f32.xlu2 %v1363_v29 }
 0x29d   : > { %v1364_v30 = vpop.f32.mrf.mxu3 }
 0x29e   : > { %v1365_v31 = vadd.f32 %v1364_v30, %v1259_v18 }
 0x2a0   : > { %1413 = vadd.xlane.f32.xlu0 %v1365_v31 }
 0x2a5   : > { %v1367_v32 = vpop.f32.mrf.mxu3 }
 0x2a6   : > { %v1368_v33 = vadd.f32 %v1367_v32, %v1259_v18 }
 0x2a8   : > { %1415 = vadd.xlane.f32.xlu0 %v1368_v33 }
 0x2ad   : > { %v1369_v39 = vpop.f32.mrf.mxu3 }
 0x2ae   : > { %v1370_v42 = vadd.f32 %v1369_v39, %v1259_v18 }
 0x2f6   : > { %v1404_v34 = vpop.xlane.xlu1 %1403 }
 0x2f7   : > { %v1419_v3 = vmul.f32 %v1404_v34, %v4110_v61 }
 0x2f9   : > { %v4263_v35 = vsub.f32 %v1353_v22, %v1419_v3 }
 0x2fb   : > { %v1435_v4 = vmul.f32 %v4263_v35, %v4263_v35  ;;  %v1408_v40 = vpop.xlane.xlu0 %1407 }
 0x2fc   : > { %v1421_v14 = vmul.f32 %v1408_v40, %v4110_v61 }
 0x2fd   : > { %1443 = vadd.xlane.f32.xlu1 %v1435_v4 }
 0x2fe   : > { %v1406_v37 = vpop.xlane.xlu2 %1405  ;;  %v4276_v46 = vsub.f32 %v1358_v23, %v1421_v14 }
 0x2ff   : > { %v1420_v38 = vmul.f32 %v1406_v37, %v4110_v61 }
 0x300   : > { %v1437_v49 = vmul.f32 %v4276_v46, %v4276_v46 }
 0x301   : > { %v4268_v41 = vsub.f32 %v1355_v25, %v1420_v38 }
 0x303   : > { %v1410_v43 = vpop.xlane.xlu1 %1409  ;;  %v1436_v44 = vmul.f32 %v4268_v41, %v4268_v41 }
 0x304   : > { %v1422_v16 = vmul.f32 %v1410_v43, %v4110_v61 }
 0x305   : > { %1445 = vadd.xlane.f32.xlu2 %v1436_v44  ;;  %1417 = vadd.xlane.f32.xlu1 %v1370_v42 }
 0x306   : > { %v4274_v45 = vsub.f32 %v1360_v26, %v1422_v16 }
 0x308   : > { %v1438_v47 = vmul.f32 %v4274_v45, %v4274_v45 }
 0x30a   : > { %1449 = vadd.xlane.f32.xlu0 %v1438_v47  ;;  %v4321_v47 = vld [vmem:[%s825_s28] ss:$0 sm:$0xff] }
 0x30b   : > { %v1412_v48 = vpop.xlane.xlu2 %1411 }
 0x30c   : > { %v1423_v36 = vmul.f32 %v1412_v48, %v4110_v61 }
 0x30d   : > { %1447 = vadd.xlane.f32.xlu2 %v1437_v49 }
 0x30e   : > { %v4283_v51 = vsub.f32 %v1363_v29, %v1423_v36 }
 0x310   : > { %v1439_v52 = vmul.f32 %v4283_v51, %v4283_v51 }
 0x312   : > { %1451 = vadd.xlane.f32.xlu1 %v1439_v52 }
 0x313   : > { %v1414_v53 = vpop.xlane.xlu0 %1413 }
 0x314   : > { %v1424_v54 = vmul.f32 %v1414_v53, %v4110_v61 }
 0x316   : > { %v4288_v55 = vsub.f32 %v1365_v31, %v1424_v54 }
 0x318   : > { %v1440_v56 = vmul.f32 %v4288_v55, %v4288_v55 }
 0x31a   : > { %1453 = vadd.xlane.f32.xlu2 %v1440_v56 }
 0x31b   : > { %v1416_v57 = vpop.xlane.xlu0 %1415 }
 0x31c   : > { %v1425_v58 = vmul.f32 %v1416_v57, %v4110_v61 }
 0x31e   : > { %v4293_v59 = vsub.f32 %v1368_v33, %v1425_v58 }
 0x320   : > { %v1441_v60 = vmul.f32 %v4293_v59, %v4293_v59 }
 0x322   : > { %1455 = vadd.xlane.f32.xlu0 %v1441_v60  ;;  %v4328_v60 = vld [vmem:[%s834_s30] ss:$0 sm:$0xff] }
 0x370   : > { %v1444_v5 = vpop.xlane.xlu1 %1443 }
 0x371   : > { %v1459_v6 = vmul.f32 %v1444_v5, %v4110_v61 }
 0x373   : > { %v1467_v7 = vadd.f32 1e-06, %v1459_v6 }
 0x375   : > { %2926 = vrsqrt.f32 %v1467_v7  ;;  %vm1481_vm12 = vweird.f32 %v1467_v7 }
 0x378   : > { %v1446_v9 = vpop.xlane.xlu2 %1445  ;;  %v1418_v10 = vpop.xlane.xlu1 %1417 }
 0x379   : > { %v1460_v2 = vmul.f32 %v1446_v9, %v4110_v61  ;;  %v1426_v11 = vmul.f32 %v1418_v10, %v4110_v61 }
 0x37b   : > { %v2927_v12 = vpop.eup %2926  ;;  %v1468_v15 = vadd.f32 1e-06, %v1460_v2  ;;  %v4308_v18 = vsub.f32 %v1370_v42, %v1426_v11 }
 0x37c   : > { %v1476_v19 = vmul.f32 %v2927_v12, %v1467_v7  ;;  %vm1482_vm11 = vweird.f32 %v2927_v12 }
 0x37d   : > { %2928 = vrsqrt.f32 %v1468_v15  ;;  %v1450_v22 = vpop.xlane.xlu0 %1449  ;;  %v1442_v28 = vmul.f32 %v4308_v18, %v4308_v18  ;;  %vm1483_vm13 = vmor %vm1481_vm12, %vm1482_vm11  ;;  %vm1491_vm15 = vweird.f32 %v1468_v15 }
 0x37e   : > { %v1477_v23 = vmul.f32 %v2927_v12, %v1476_v19  ;;  %v1462_v24 = vmul.f32 %v1450_v22, %v4110_v61 }
 0x37f   : > { %1457 = vadd.xlane.f32.xlu1 %v1442_v28 }
 0x380   : > { %v1478_v25 = vmul.f32 0.5, %v1477_v23  ;;  %v1470_v21 = vadd.f32 1e-06, %v1462_v24  ;;  %v1448_v26 = vpop.xlane.xlu2 %1447 }
 0x381   : > { %v1461_v27 = vmul.f32 %v1448_v26, %v4110_v61 }
 0x382   : > { %v1479_v29 = vsub.f32 1.5, %v1478_v25  ;;  %2930 = vrsqrt.f32 %v1470_v21  ;;  %vm1511_vm5 = vweird.f32 %v1470_v21 }
 0x383   : > { %v2929_v30 = vpop.eup %2928  ;;  %v1469_v31 = vadd.f32 1e-06, %v1461_v27 }
 0x384   : > { %v1480_v32 = vmul.f32 %v2927_v12, %v1479_v29  ;;  %v1486_v33 = vmul.f32 %v2929_v30, %v1468_v15  ;;  %vm1492_vm14 = vweird.f32 %v2929_v30 }
 0x385   : > { %2932 = vrsqrt.f32 %v1469_v31  ;;  %v1452_v34 = vpop.xlane.xlu1 %1451  ;;  %vm1493_vm0 = vmor %vm1491_vm15, %vm1492_vm14  ;;  %vm1501_vm2 = vweird.f32 %v1469_v31 }
 0x386   : > { %v1487_v3 = vmul.f32 %v2929_v30, %v1486_v33  ;;  %v1463_v4 = vmul.f32 %v1452_v34, %v4110_v61  ;;  %v1484_v40 = vsel %vm1483_vm13, %v2927_v12, %v1480_v32 }
 0x387   : > { %v1555_v16 = vmul.f32 %v1484_v40, %v4263_v35 }
 0x388   : > { %v2931_v37 = vpop.eup %2930  ;;  %v1488_v38 = vmul.f32 0.5, %v1487_v3  ;;  %v4315_v39 = vadd.f32 1e-06, %v1463_v4 }
 0x389   : > { %v1506_v42 = vmul.f32 %v2931_v37, %v1470_v21  ;;  %v1566_v58 = vmul.f32 %v4321_v47, %v1555_v16  ;;  %vm1512_vm3 = vweird.f32 %v2931_v37 }
 0x38a   : > { %v1489_v14 = vsub.f32 1.5, %v1488_v38  ;;  %2934 = vrsqrt.f32 %v4315_v39  ;;  %vm1513_vm6 = vmor %vm1511_vm5, %vm1512_vm3  ;;  %vm1521_vm11 = vweird.f32 %v4315_v39  ;;  %vm1739_vm3 = vcmask 1041409  }
 0x38b   : > { %v2933_v43 = vpop.eup %2932  ;;  %v1507_v44 = vmul.f32 %v2931_v37, %v1506_v42  ;;  %v1577_v20 = vadd.f32 %v4328_v60, %v1566_v58  ;;  %vm1743_vm5 = vcmask 1043459  }
 0x38c   : > { %v1490_v48 = vmul.f32 %v2929_v30, %v1489_v14  ;;  %v1496_v49 = vmul.f32 %v2933_v43, %v1469_v31  ;;  %vm1502_vm1 = vweird.f32 %v2933_v43 }
 0x38d   : > { %v1508_v36 = vmul.f32 0.5, %v1507_v44  ;;  %v1454_v52 = vpop.xlane.xlu2 %1453  ;;  %vm1503_vm4 = vmor %vm1501_vm2, %vm1502_vm1 }
 0x38e   : > { %v1497_v53 = vmul.f32 %v2933_v43, %v1496_v49  ;;  %v1464_v54 = vmul.f32 %v1454_v52, %v4110_v61  ;;  %v1494_v56 = vsel %vm1493_vm0, %v2929_v30, %v1490_v48 }
 0x38f   : > { %v1556_v57 = vmul.f32 %v1494_v56, %v4268_v41  ;;  %v1509_v35 = vsub.f32 1.5, %v1508_v36 }
 0x390   : > { %v1498_v62 = vmul.f32 0.5, %v1497_v53  ;;  %v1472_v63 = vadd.f32 1e-06, %v1464_v54  ;;  %v2935_v0 = vpop.eup %2934 }
 0x391   : > { %v1567_v1 = vmul.f32 %v4321_v47, %v1556_v57  ;;  %v1510_v41 = vmul.f32 %v2931_v37, %v1509_v35  ;;  %v1516_v6 = vmul.f32 %v2935_v0, %v4315_v39  ;;  %vm1522_vm8 = vweird.f32 %v2935_v0 }
 0x392   : > { %v1499_v50 = vsub.f32 1.5, %v1498_v62  ;;  %2936 = vrsqrt.f32 %v1472_v63  ;;  %vm1531_vm9 = vweird.f32 %v1472_v63  ;;  %vm1523_vm12 = vmor %vm1521_vm11, %vm1522_vm8  ;;  %vm1749_vm8 = vcmask 1046534  }
 0x393   : > { %v1578_v5 = vadd.f32 %v4328_v60, %v1567_v1  ;;  %v1517_v10 = vmul.f32 %v2935_v0, %v1516_v6  ;;  %v1514_v2 = vsel %vm1513_vm6, %v2931_v37, %v1510_v41  ;;  %v4362_v6 = vpop.f32.mrf.mxu1  ;;  %vm1745_vm6 = vcmask 1044484  }
 0x394   : > { %v1500_v13 = vmul.f32 %v2933_v43, %v1499_v50  ;;  %v1558_v19 = vmul.f32 %v1514_v2, %v4274_v45 }
 0x395   : > { %v1585_v7 = vpack.c.bf16 %v1578_v5, %v1577_v20  ;;  %v1518_v22 = vmul.f32 0.5, %v1517_v10  ;;  %v1456_v40 = vpop.xlane.xlu0 %1455 }
 0x396   : > { %v1504_v8 = vsel %vm1503_vm4, %v2933_v43, %v1500_v13  ;;  %v1569_v25 = vmul.f32 %v4321_v47, %v1558_v19  ;;  %v1465_v39 = vmul.f32 %v1456_v40, %v4110_v61  ;;  %vm1741_vm4 = vcmask 1042434  }
 0x397   : > { %1661 = vmatmul.bf16.vlgmr.msra.gmra.mxu2 %v1585_v7  ;;  %v1557_v12 = vmul.f32 %v1504_v8, %v4276_v46  ;;  %v1519_v21 = vsub.f32 1.5, %v1518_v22 }
 0x398   : > { %v2937_v9 = vpop.eup %2936  ;;  %v1580_v29 = vadd.f32 %v4328_v60, %v1569_v25  ;;  %v1473_v42 = vadd.f32 1e-06, %v1465_v39 }
 0x399   : > { %v1526_v11 = vmul.f32 %v2937_v9, %v1472_v63  ;;  %v1568_v23 = vmul.f32 %v4321_v47, %v1557_v12  ;;  %vm1532_vm7 = vweird.f32 %v2937_v9  ;;  %v1520_v30 = vmul.f32 %v2935_v0, %v1519_v21 }
 0x39a   : > { %vm1533_vm10 = vmor %vm1531_vm9, %vm1532_vm7  ;;  %2938 = vrsqrt.f32 %v1473_v42  ;;  %vm1541_vm14 = vweird.f32 %v1473_v42  ;;  %vm1747_vm7 = vcmask 1045509   ;;  %vm1751_vm9 = vcmask 1047559  }
 0x39b   : > { %v1527_v15 = vmul.f32 %v2937_v9, %v1526_v11  ;;  %v1579_v26 = vadd.f32 %v4328_v60, %v1568_v23  ;;  %v1524_v31 = vsel %vm1523_vm12, %v2935_v0, %v1520_v30  ;;  %v4366_v7 = vpop.f32.mrf.mxu1 }
 0x39c   : > { %v1559_v33 = vmul.f32 %v1524_v31, %v4283_v51 }
 0x39d   : > { %v1528_v28 = vmul.f32 0.5, %v1527_v15  ;;  %v1586_v46 = vpack.c.bf16 %v1580_v29, %v1579_v26 }
 0x39e   : > { %v1570_v3 = vmul.f32 %v4321_v47, %v1559_v33 }
 0x39f   : > { %v1529_v24 = vsub.f32 1.5, %v1528_v28 }
 0x3a0   : > { %v1581_v37 = vadd.f32 %v4328_v60, %v1570_v3  ;;  %v2939_v14 = vpop.eup %2938 }
 0x3a1   : > { %v1530_v27 = vmul.f32 %v2937_v9, %v1529_v24  ;;  %v1536_v43 = vmul.f32 %v2939_v14, %v1473_v42  ;;  %vm1542_vm13 = vweird.f32 %v2939_v14 }
 0x3a2   : > { %vm1543_vm15 = vmor %vm1541_vm14, %vm1542_vm13 }
 0x3a3   : > { %v1534_v45 = vsel %vm1533_vm10, %v2937_v9, %v1530_v27  ;;  %v4370_v8 = vpop.f32.mrf.mxu1 }
 0x3a4   : > { %v1560_v32 = vmul.f32 %v1534_v45, %v4288_v55  ;;  %v1537_v55 = vmul.f32 %v2939_v14, %v1536_v43 }
 0x3a6   : > { %v1571_v34 = vmul.f32 %v4321_v47, %v1560_v32  ;;  %v1538_v48 = vmul.f32 0.5, %v1537_v55 }
 0x3a7   : > { %1666 = vmatmul.bf16.gmra.mxu2 %v1586_v46 }
 0x3a8   : > { %v1582_v4 = vadd.f32 %v4328_v60, %v1571_v34  ;;  %v1539_v49 = vsub.f32 1.5, %v1538_v48 }
 0x3aa   : > { %v1587_v38 = vpack.c.bf16 %v1582_v4, %v1581_v37  ;;  %v1540_v52 = vmul.f32 %v2939_v14, %v1539_v49 }
 0x3ab   : > { %v4382_v28 = vpop.f32.mrf.mxu1 }
 0x3ac   : > { %v1544_v57 = vsel %vm1543_vm15, %v2939_v14, %v1540_v52 }
 0x3ad   : > { %v1561_v35 = vmul.f32 %v1544_v57, %v4293_v59 }
 0x3af   : > { %v1572_v0 = vmul.f32 %v4321_v47, %v1561_v35 }
 0x3b1   : > { %v1583_v50 = vadd.f32 %v4328_v60, %v1572_v0 }
 0x3b3   : > { %v4392_v39 = vpop.f32.mrf.mxu1 }
 0x3b7   : > { %1671 = vmatmul.bf16.gmra.mxu2 %v1587_v38 }
 0x3f2   : > { %v1458_v44 = vpop.xlane.xlu1 %1457 }
 0x3f3   : > { %v1466_v51 = vmul.f32 %v1458_v44, %v4110_v61 }
 0x3f5   : > { %v1474_v16 = vadd.f32 1e-06, %v1466_v51 }
 0x3f7   : > { %2940 = vrsqrt.f32 %v1474_v16  ;;  %vm1551_vm1 = vweird.f32 %v1474_v16 }
 0x3fd   : > { %v2941_v36 = vpop.eup %2940 }
 0x3fe   : > { %v1546_v53 = vmul.f32 %v2941_v36, %v1474_v16  ;;  %vm1552_vm0 = vweird.f32 %v2941_v36 }
 0x3ff   : > { %vm1553_vm2 = vmor %vm1551_vm1, %vm1552_vm0 }
 0x400   : > { %v1547_v54 = vmul.f32 %v2941_v36, %v1546_v53 }
 0x402   : > { %v1548_v56 = vmul.f32 0.5, %v1547_v54 }
 0x404   : > { %v1549_v58 = vsub.f32 1.5, %v1548_v56 }
 0x406   : > { %v1550_v62 = vmul.f32 %v2941_v36, %v1549_v58 }
 0x408   : > { %v1554_v61 = vsel %vm1553_vm2, %v2941_v36, %v1550_v62 }
 0x409   : > { %v1562_v63 = vmul.f32 %v1554_v61, %v4308_v18 }
 0x40b   : > { %v1573_v1 = vmul.f32 %v4321_v47, %v1562_v63 }
 0x40d   : > { %v1584_v20 = vadd.f32 %v4328_v60, %v1573_v1 }
 0x40f   : > { %v1588_v5 = vpack.c.bf16 %v1584_v20, %v1583_v50  ;;  %v4400_v20 = vpop.f32.mrf.mxu1 }
 0x411   : > { %1676 = vmatmul.bf16.gmra.mxu2 %v1588_v5 }
 0x41a   : > { %v4355_v41 = vpop.f32.mrf.mxu2 }
 0x41b   : > { %v1683_v2 = vrot.slane %v4355_v41, 4 }
 0x41d   : > { %v1684_v23 = vmax.f32 %v4355_v41, %v1683_v2 }
 0x41f   : > { %v1685_v30 = vrot.slane %v1684_v23, 2 }
 0x421   : > { %v1686_v4 = vmax.f32 %v1684_v23, %v1685_v30 }
 0x422   : > { %v4358_v59 = vpop.f32.mrf.mxu2 }
 0x423   : > { %v1689_v60 = vrot.slane %v4358_v59, 4  ;;  %v1687_v51 = vrot.slane %v1686_v4, 1 }
 0x425   : > { %v1690_v15 = vmax.f32 %v4358_v59, %v1689_v60  ;;  %v1688_v57 = vmax.f32 %v1686_v4, %v1687_v51 }
 0x427   : > { %v1691_v21 = vrot.slane %v1690_v15, 2 }
 0x429   : > { %v1692_v32 = vmax.f32 %v1690_v15, %v1691_v21 }
 0x42a   : > { %v4360_v13 = vpop.f32.mrf.mxu2 }
 0x42b   : > { %v1695_v9 = vrot.slane %v4360_v13, 4  ;;  %v1693_v42 = vrot.slane %v1692_v32, 1 }
 0x42d   : > { %v1696_v22 = vmax.f32 %v4360_v13, %v1695_v9  ;;  %v1694_v36 = vmax.f32 %v1692_v32, %v1693_v42 }
 0x42f   : > { %v1697_v27 = vrot.slane %v1696_v22, 2  ;;  %v1740_v61 = vsel %vm1739_vm3, %v1694_v36, %v1688_v57 }
 0x431   : > { %v1698_v3 = vmax.f32 %v1696_v22, %v1697_v27 }
 0x432   : > { %v4364_v18 = vpop.f32.mrf.mxu2 }
 0x433   : > { %v1701_v11 = vrot.slane %v4364_v18, 4  ;;  %v1699_v43 = vrot.slane %v1698_v3, 1 }
 0x435   : > { %v1702_v24 = vmax.f32 %v4364_v18, %v1701_v11  ;;  %v1700_v54 = vmax.f32 %v1698_v3, %v1699_v43  ;;  %v1682_v11 = vld [vmem:[#allocation2] sm:$0xff] }
 0x437   : > { %v1703_v46 = vrot.slane %v1702_v24, 2  ;;  %v1742_v1 = vsel %vm1741_vm4, %v1700_v54, %v1740_v61 }
 0x439   : > { %v1704_v37 = vmax.f32 %v1702_v24, %v1703_v46 }
 0x43a   : > { %v4368_v47 = vpop.f32.mrf.mxu2 }
 0x43b   : > { %v1707_v12 = vrot.slane %v4368_v47, 4  ;;  %v1705_v16 = vrot.slane %v1704_v37, 1 }
 0x43d   : > { %v1708_v25 = vmax.f32 %v4368_v47, %v1707_v12  ;;  %v1706_v58 = vmax.f32 %v1704_v37, %v1705_v16 }
 0x43f   : > { %v1709_v31 = vrot.slane %v1708_v25, 2  ;;  %v1744_v5 = vsel %vm1743_vm5, %v1706_v58, %v1742_v1  ;;  %v1806_v58 = vld [vmem:[#allocation3] sm:$0xff] }
 0x441   : > { %v1710_v40 = vmax.f32 %v1708_v25, %v1709_v31 }
 0x442   : > { %v4374_v10 = vpop.f32.mrf.mxu2 }
 0x443   : > { %v1713_v19 = vrot.slane %v4374_v10, 4  ;;  %v1711_v49 = vrot.slane %v1710_v40, 1 }
 0x445   : > { %v1714_v26 = vmax.f32 %v4374_v10, %v1713_v19  ;;  %v1712_v62 = vmax.f32 %v1710_v40, %v1711_v49 }
 0x447   : > { %v1715_v33 = vrot.slane %v1714_v26, 2  ;;  %v1746_v9 = vsel %vm1745_vm6, %v1712_v62, %v1744_v5 }
 0x449   : > { %v1716_v14 = vmax.f32 %v1714_v26, %v1715_v33 }
 0x44b   : > { %v1717_v52 = vrot.slane %v1716_v14, 1 }
 0x44d   : > { %v1718_v63 = vmax.f32 %v1716_v14, %v1717_v52 }
 0x44f   : > { %v1748_v2 = vsel %vm1747_vm7, %v1718_v63, %v1746_v9 }
 0x494   : > { %v4388_v29 = vpop.f32.mrf.mxu2 }
 0x495   : > { %v1719_v45 = vrot.slane %v4388_v29, 4 }
 0x497   : > { %v1720_v34 = vmax.f32 %v4388_v29, %v1719_v45 }
 0x499   : > { %v1721_v38 = vrot.slane %v1720_v34, 2 }
 0x49b   : > { %v1722_v55 = vmax.f32 %v1720_v34, %v1721_v38  ;;  %v1396_v34 = vpop.f32.mrf.mxu1 }
 0x49c   : > { %v4394_v44 = vpop.f32.mrf.mxu2 }
 0x49d   : > { %v1725_v48 = vrot.slane %v4394_v44, 4  ;;  %v1723_v56 = vrot.slane %v1722_v55, 1 }
 0x49f   : > { %v1726_v53 = vmax.f32 %v4394_v44, %v1725_v48  ;;  %v1724_v50 = vmax.f32 %v1722_v55, %v1723_v56 }
 0x4a1   : > { %v1727_v35 = vrot.slane %v1726_v53, 2  ;;  %v1750_v15 = vsel %vm1749_vm8, %v1724_v50, %v1748_v2 }
 0x4a3   : > { %v1728_v0 = vmax.f32 %v1726_v53, %v1727_v35  ;;  %v1398_v57 = vpop.f32.mrf.mxu1 }
 0x4a5   : > { %v1729_v60 = vrot.slane %v1728_v0, 1 }
 0x4a7   : > { %v1730_v12 = vmax.f32 %v1728_v0, %v1729_v60 }
 0x4a9   : > { %v1752_v19 = vsel %vm1751_vm9, %v1730_v12, %v1750_v15 }
 0x4aa   : > { %v1754_v22 = vmax.f32 %v1682_v11, %v1752_v19 }
 0x4ac   : > { %v1755_v23 = vsub.f32 %v1682_v11, %v1754_v22  ;;  %v1759_v24 = vrot.slane %v1754_v22, 1  ;;  %v1760_v25 = vrot.slane %v1754_v22, 2  ;;  %v1761_v21 = vrot.slane %v1754_v22, 3  ;;  %1950 = vst [vmem:[#allocation2] sm:$0xff] %v1754_v22 }
 0x4ad   : > { %v1762_v26 = vrot.slane %v1754_v22, 4  ;;  %v1763_v27 = vrot.slane %v1754_v22, 5  ;;  %v1764_v30 = vrot.slane %v1754_v22, 6  ;;  %v1765_v46 = vrot.slane %v1754_v22, 7 }
 0x4ae   : > { %v1756_v45 = vmul.f32 1.442695, %v1755_v23  ;;  %v1766_v31 = vperm.slane %v1754_v22, 0  ;;  %v1767_v32 = vperm.slane %v1759_v24, 0  ;;  %v1768_v33 = vperm.slane %v1760_v25, 0 }
 0x4af   : > { %v1769_v3 = vperm.slane %v1761_v21, 0  ;;  %v1770_v4 = vperm.slane %v1762_v26, 0  ;;  %v1771_v37 = vperm.slane %v1763_v27, 0  ;;  %v1772_v38 = vperm.slane %v1764_v30, 0 }
 0x4b0   : > { %v1773_v40 = vperm.slane %v1765_v46, 0  ;;  %v1782_v42 = vsub.f32 %v4355_v41, %v1766_v31  ;;  %v1783_v14 = vsub.f32 %v4358_v59, %v1767_v32  ;;  %v1784_v43 = vsub.f32 %v4360_v13, %v1768_v33 }
 0x4b1   : > { %v1785_v55 = vsub.f32 %v4364_v18, %v1769_v3  ;;  %v1786_v51 = vsub.f32 %v4368_v47, %v1770_v4  ;;  %v1787_v16 = vsub.f32 %v4374_v10, %v1771_v37  ;;  %v1788_v48 = vsub.f32 %v4388_v29, %v1772_v38 }
 0x4b2   : > { %v1790_v49 = vmul.f32 1.442695, %v1782_v42  ;;  %v1792_v36 = vmul.f32 1.442695, %v1783_v14  ;;  %2942 = vpow2.f32 %v1756_v45  ;;  %v1789_v52 = vsub.f32 %v4394_v44, %v1773_v40 }
 0x4b3   : > { %v1794_v53 = vmul.f32 1.442695, %v1784_v43  ;;  %v1796_v54 = vmul.f32 1.442695, %v1785_v55  ;;  %v1798_v41 = vmul.f32 1.442695, %v1786_v51 }
 0x4b4   : > { %2944 = vpow2.f32 %v1790_v49  ;;  %v1260_v59 = vperm.slane %v4259_v17, 1  ;;  %v1800_v13 = vmul.f32 1.442695, %v1787_v16  ;;  %v1802_v18 = vmul.f32 1.442695, %v1788_v48 }
 0x4b5   : > { %2946 = vpow2.f32 %v1792_v36  ;;  %v1804_v47 = vmul.f32 1.442695, %v1789_v52 }
 0x4b6   : > { %2948 = vpow2.f32 %v1794_v53  ;;  %v1382_v29 = vadd.f32 %v4362_v6, %v1260_v59  ;;  %v1384_v56 = vadd.f32 %v4366_v7, %v1260_v59  ;;  %v1387_v44 = vadd.f32 %v4370_v8, %v1260_v59 }
 0x4b7   : > { %2950 = vpow2.f32 %v1796_v54  ;;  %v1389_v17 = vadd.f32 %v4382_v28, %v1260_v59  ;;  %v1392_v62 = vadd.f32 %v4392_v39, %v1260_v59  ;;  %v1394_v61 = vadd.f32 %v4400_v20, %v1260_v59 }
 0x4b8   : > { %2952 = vpow2.f32 %v1798_v41  ;;  %v4416_v10 = vpop.eup %2942  ;;  %v1397_v0 = vadd.f32 %v1396_v34, %v1260_v59  ;;  %v1399_v50 = vadd.f32 %v1398_v57, %v1260_v59 }
 0x4b9   : > { %2954 = vpow2.f32 %v1800_v13  ;;  %v4427_v8 = vmul.f32 %v4416_v10, %v1806_v58 }
 0x4ba   : > { %v2945_v35 = vpop.eup %2944  ;;  %2956 = vpow2.f32 %v1802_v18 }
 0x4bb   : > { %v2947_v63 = vpop.eup %2946  ;;  %2958 = vpow2.f32 %v1804_v47  ;;  %v1808_v1 = vrot.slane %v2945_v35, 4  ;;  %v4424_v6 = vmul.f32 %v2945_v35, %v1382_v29 }
 0x4bc   : > { %v2949_v7 = vpop.eup %2948  ;;  %v1814_v5 = vrot.slane %v2947_v63, 4  ;;  %v4429_v60 = vmul.f32 %v2947_v63, %v1384_v56 }
 0x4bd   : > { %v2951_v28 = vpop.eup %2950  ;;  %v1809_v9 = vadd.f32 %v2945_v35, %v1808_v1  ;;  %v1820_v39 = vrot.slane %v2949_v7, 4  ;;  %v4431_v2 = vmul.f32 %v2949_v7, %v1387_v44  ;;  %v1884_v20 = vrot.slane %v4424_v6, 4 }
 0x4be   : > { %v2953_v11 = vpop.eup %2952  ;;  %v1815_v12 = vadd.f32 %v2947_v63, %v1814_v5  ;;  %v1826_v15 = vrot.slane %v2951_v28, 4  ;;  %v4434_v19 = vmul.f32 %v2951_v28, %v1389_v17  ;;  %v1890_v22 = vrot.slane %v4429_v60, 4 }
 0x4bf   : > { %v2955_v23 = vpop.eup %2954  ;;  %v1810_v24 = vrot.slane %v1809_v9, 2  ;;  %v1821_v25 = vadd.f32 %v2949_v7, %v1820_v39  ;;  %v1832_v21 = vrot.slane %v2953_v11, 4  ;;  %v4437_v26 = vmul.f32 %v2953_v11, %v1392_v62 }
 0x4c0   : > { %v2957_v27 = vpop.eup %2956  ;;  %v1816_v30 = vrot.slane %v1815_v12, 2  ;;  %v1827_v46 = vadd.f32 %v2951_v28, %v1826_v15  ;;  %v1838_v45 = vrot.slane %v2955_v23, 4  ;;  %v4439_v31 = vmul.f32 %v2955_v23, %v1394_v61 }
 0x4c1   : > { %v2959_v32 = vpop.eup %2958  ;;  %v1811_v33 = vadd.f32 %v1810_v24, %v1809_v9  ;;  %v1822_v34 = vrot.slane %v1821_v25, 2  ;;  %v1833_v3 = vadd.f32 %v2953_v11, %v1832_v21  ;;  %v1844_v4 = vrot.slane %v2957_v27, 4 }
 0x4c2   : > { %v1817_v37 = vadd.f32 %v1816_v30, %v1815_v12  ;;  %v1828_v38 = vrot.slane %v1827_v46, 2  ;;  %v1839_v40 = vadd.f32 %v2955_v23, %v1838_v45  ;;  %v1850_v42 = vrot.slane %v2959_v32, 4 }
 0x4c3   : > { %v1812_v14 = vrot.slane %v1811_v33, 1  ;;  %v1823_v43 = vadd.f32 %v1822_v34, %v1821_v25  ;;  %v1834_v55 = vrot.slane %v1833_v3, 2  ;;  %v1845_v51 = vadd.f32 %v2957_v27, %v1844_v4 }
 0x4c4   : > { %v1818_v16 = vrot.slane %v1817_v37, 1  ;;  %v1829_v48 = vadd.f32 %v1828_v38, %v1827_v46  ;;  %v1840_v49 = vrot.slane %v1839_v40, 2  ;;  %v1851_v36 = vadd.f32 %v2959_v32, %v1850_v42 }
 0x4c5   : > { %v1813_v52 = vadd.f32 %v1812_v14, %v1811_v33  ;;  %v1824_v53 = vrot.slane %v1823_v43, 1  ;;  %v1835_v54 = vadd.f32 %v1834_v55, %v1833_v3  ;;  %v1846_v41 = vrot.slane %v1845_v51, 2 }
 0x4c6   : > { %v1819_v59 = vadd.f32 %v1818_v16, %v1817_v37  ;;  %v1830_v13 = vrot.slane %v1829_v48, 1  ;;  %v1841_v18 = vadd.f32 %v1840_v49, %v1839_v40  ;;  %v1852_v47 = vrot.slane %v1851_v36, 2 }
 0x4c7   : > { %v1825_v29 = vadd.f32 %v1824_v53, %v1823_v43  ;;  %v1836_v56 = vrot.slane %v1835_v54, 1  ;;  %v1847_v44 = vadd.f32 %v1846_v41, %v1845_v51  ;;  %v1882_v57 = vmul.f32 %v2957_v27, %v1397_v0 }
 0x4c8   : > { %v1831_v58 = vadd.f32 %v1830_v13, %v1829_v48  ;;  %v1842_v35 = vrot.slane %v1841_v18, 1  ;;  %v1853_v17 = vadd.f32 %v1852_v47, %v1851_v36  ;;  %v1864_v62 = vsel %vm1739_vm3, %v1819_v59, %v1813_v52 }
 0x4c9   : > { %v1837_v61 = vadd.f32 %v1836_v56, %v1835_v54  ;;  %v1848_v63 = vrot.slane %v1847_v44, 1  ;;  %v1865_v1 = vsel %vm1741_vm4, %v1825_v29, %v1864_v62  ;;  %v1883_v7 = vmul.f32 %v2959_v32, %v1399_v50 }
 0x4ca   : > { %v1843_v5 = vadd.f32 %v1842_v35, %v1841_v18  ;;  %v1854_v28 = vrot.slane %v1853_v17, 1  ;;  %v1866_v9 = vsel %vm1743_vm5, %v1831_v58, %v1865_v1  ;;  %v1885_v39 = vadd.f32 %v1884_v20, %v4424_v6  ;;  %v1874_v35 = vld [vmem:[#allocation4] sm:$0xff] }
 0x4cb   : > { %v1849_v11 = vadd.f32 %v1848_v63, %v1847_v44  ;;  %v1867_v12 = vsel %vm1745_vm6, %v1837_v61, %v1866_v9  ;;  %v1891_v0 = vadd.f32 %v1890_v22, %v4429_v60  ;;  %v1896_v15 = vrot.slane %v4431_v2, 4 }
 0x4cc   : > { %v1855_v23 = vadd.f32 %v1854_v28, %v1853_v17  ;;  %v1868_v24 = vsel %vm1747_vm7, %v1843_v5, %v1867_v12  ;;  %v1886_v25 = vrot.slane %v1885_v39, 2  ;;  %v1902_v21 = vrot.slane %v4434_v19, 4 }
 0x4cd   : > { %v1869_v50 = vsel %vm1749_vm8, %v1849_v11, %v1868_v24  ;;  %v1892_v27 = vrot.slane %v1891_v0, 2  ;;  %v1897_v30 = vadd.f32 %v1896_v15, %v4431_v2  ;;  %v1908_v6 = vrot.slane %v4437_v26, 4 }
 0x4ce   : > { %v1870_v20 = vsel %vm1751_vm9, %v1855_v23, %v1869_v50  ;;  %v1887_v46 = vadd.f32 %v1886_v25, %v1885_v39  ;;  %v1903_v60 = vadd.f32 %v1902_v21, %v4434_v19  ;;  %v1914_v22 = vrot.slane %v4439_v31, 4 }
 0x4cf   : > { %v1872_v45 = vadd.f32 %v1870_v20, %v4427_v8  ;;  %v1893_v32 = vadd.f32 %v1892_v27, %v1891_v0  ;;  %v1898_v33 = vrot.slane %v1897_v30, 2  ;;  %v1909_v34 = vadd.f32 %v1908_v6, %v4437_v26 }
 0x4d0   : > { %v1888_v3 = vrot.slane %v1887_v46, 1  ;;  %v1904_v4 = vrot.slane %v1903_v60, 2  ;;  %v1915_v37 = vadd.f32 %v1914_v22, %v4439_v31  ;;  %v1920_v2 = vrot.slane %v1882_v57, 4 }
 0x4d1   : > { %1873 = vst [vmem:[#allocation3] sm:$0xff] %v1872_v45  ;;  %v1894_v38 = vrot.slane %v1893_v32, 1  ;;  %v1899_v40 = vadd.f32 %v1898_v33, %v1897_v30  ;;  %v1910_v42 = vrot.slane %v1909_v34, 2  ;;  %v1926_v14 = vrot.slane %v1883_v7, 4 }
 0x4d2   : > { %v1889_v43 = vadd.f32 %v1888_v3, %v1887_v46  ;;  %v1905_v19 = vadd.f32 %v1904_v4, %v1903_v60  ;;  %v1916_v55 = vrot.slane %v1915_v37, 2  ;;  %v1921_v51 = vadd.f32 %v1920_v2, %v1882_v57 }
 0x4d3   : > { %v1895_v16 = vadd.f32 %v1894_v38, %v1893_v32  ;;  %v1900_v8 = vrot.slane %v1899_v40, 1  ;;  %v1911_v48 = vadd.f32 %v1910_v42, %v1909_v34  ;;  %v1927_v49 = vadd.f32 %v1926_v14, %v1883_v7 }
 0x4d4   : > { %v1906_v36 = vrot.slane %v1905_v19, 1  ;;  %v1917_v26 = vadd.f32 %v1916_v55, %v1915_v37  ;;  %v1922_v52 = vrot.slane %v1921_v51, 2  ;;  %v1875_v7 = vmul.f32 %v4416_v10, %v1874_v35 }
 0x4d5   : > { %v1901_v53 = vadd.f32 %v1900_v8, %v1899_v40  ;;  %v1912_v54 = vrot.slane %v1911_v48, 1  ;;  %v1928_v31 = vrot.slane %v1927_v49, 2  ;;  %v1940_v41 = vsel %vm1739_vm3, %v1895_v16, %v1889_v43 }
 0x4d6   : > { %v1907_v59 = vadd.f32 %v1906_v36, %v1905_v19  ;;  %v1918_v13 = vrot.slane %v1917_v26, 1  ;;  %v1923_v18 = vadd.f32 %v1922_v52, %v1921_v51 }
 0x4d7   : > { %v1913_v47 = vadd.f32 %v1912_v54, %v1911_v48  ;;  %v1929_v29 = vadd.f32 %v1928_v31, %v1927_v49  ;;  %v1941_v56 = vsel %vm1741_vm4, %v1901_v53, %v1940_v41 }
 0x4d8   : > { %v1919_v44 = vadd.f32 %v1918_v13, %v1917_v26  ;;  %v1924_v57 = vrot.slane %v1923_v18, 1  ;;  %v1942_v58 = vsel %vm1743_vm5, %v1907_v59, %v1941_v56 }
 0x4d9   : > { %v1930_v17 = vrot.slane %v1929_v29, 1  ;;  %v1943_v62 = vsel %vm1745_vm6, %v1913_v47, %v1942_v58 }
 0x4da   : > { %v1925_v61 = vadd.f32 %v1924_v57, %v1923_v18  ;;  %v1944_v63 = vsel %vm1747_vm7, %v1919_v44, %v1943_v62 }
 0x4db   : > { %v1931_v1 = vadd.f32 %v1930_v17, %v1929_v29 }
 0x4dc   : > { %v1945_v5 = vsel %vm1749_vm8, %v1925_v61, %v1944_v63  ;;  %1954 = sbr.rel (%p2592_p9) target bundleno = 1415 (0x587), region = 136 }
 0x4dd   : > { %v1946_v28 = vsel %vm1751_vm9, %v1931_v1, %v1945_v5 }
 0x4de   : > { %v1948_v9 = vadd.f32 %v1946_v28, %v1875_v7 }
 0x4e0   : > { %1949 = vst [vmem:[#allocation4] sm:$0xff] %v1948_v9 }
 0x4e1   : > { %v2665_v39 = vld [vmem:[%s3997_s2 + $0x38] sm:$0xff]  ;;  %v2664_v11 = vld [vmem:[%s3997_s2 + $0x30] sm:$0xff]  ;;  %v2663_v10 = vld [vmem:[%s3997_s2 + $0x28] sm:$0xff] }
 0x4e2   : > { %2041 = vmatpush.bf16.msra.mxu0 %v2665_v39  ;;  %v1956_v12 = vld [vmem:[#allocation3] sm:$0xff]  ;;  %v2662_v15 = vld [vmem:[%s3997_s2 + $0x20] sm:$0xff]  ;;  %v2659_v60 = vld [vmem:[%s3997_s2 + $0x8] sm:$0xff] }
 0x4e3   : > { %2961 = vrcp.f32 %v1956_v12  ;;  %vm1962_vm10 = vweird.f32 %v1956_v12  ;;  %v2661_v25 = vld [vmem:[%s3997_s2 + $0x18] sm:$0xff]  ;;  %v1968_v21 = vand.u32 2147483648, %v1956_v12  ;;  %v1966_v27 = vand.u32 2147483647, %v1956_v12  ;;  %v2660_v6 = vld [vmem:[%s3997_s2 + $0x10] sm:$0xff]  ;;  %v2658_v33 = vld [vmem:[%s3997_s2] sm:$0xff] }
 0x4e4   : > { %v2960_v3 = vld [vmem:[%s978_s15] ss:$0 sm:$0xff] }
 0x4e5   : > { %v1969_v20 = vor.u32 1.1754944e-38, %v1968_v21  ;;  %vm1967_vm13 = vcmp.eq.f32.partialorder %v1966_v27, 8.507059e+37 }
 0x4e6   : > { %2042 = vmatpush.bf16.msra.mxu0 %v2664_v11 }
 0x4e7   : > { %v1955_v22 = vld [vmem:[#allocation4] sm:$0xff] }
 0x4e9   : > { %v2962_v0 = vpop.eup %2961 }
 0x4ea   : > { %2043 = vmatpush.bf16.msra.mxu0 %v2663_v10  ;;  %v1958_v23 = vmul.f32 %v2962_v0, %v1956_v12  ;;  %vm1963_vm11 = vweird.f32 %v2962_v0 }
 0x4eb   : > { %vm1964_vm12 = vmor %vm1962_vm10, %vm1963_vm11 }
 0x4ec   : > { %v1959_v24 = vsub.f32 1.0, %v1958_v23 }
 0x4ee   : > { %2044 = vmatpush.bf16.msra.mxu0 %v2662_v15  ;;  %v1960_v50 = vmul.f32 %v2962_v0, %v1959_v24 }
 0x4f0   : > { %v1961_v30 = vadd.f32 %v2962_v0, %v1960_v50 }
 0x4f2   : > { %2045 = vmatpush.bf16.msra.mxu0 %v2661_v25  ;;  %v1965_v46 = vsel %vm1964_vm12, %v2962_v0, %v1961_v30 }
 0x4f3   : > { %v1970_v45 = vsel %vm1967_vm13, %v1969_v20, %v1965_v46 }
 0x4f4   : > { %v1971_v32 = vmul.f32 %v1970_v45, %v1955_v22 }
 0x4f6   : > { %2046 = vmatpush.bf16.msra.mxu0 %v2660_v6  ;;  %v1972_v34 = vpack.c.bf16 %v1971_v32, %v1971_v32 }
 0x4fa   : > { %2047 = vmatpush.bf16.msra.mxu0 %v2659_v60 }
 0x4fe   : > { %2048 = vmatpush.bf16.msra.mxu0 %v2658_v33 }
 0x501   : > { %2049 = vmatmul.bf16.vlgmr.msra.gmra.mxu0 %v1972_v34 }
 0x57e   : > { %v2050_v4 = vpop.f32.mrf.mxu0 }
 0x57f   : > { %v2051_v37 = vadd.f32 %v2960_v3, %v2050_v4 }
 0x581   : > { %2056 = vst [vmem:[%s2055_s26] sm:$0xff] %v2051_v37 }
 0x586   : > { %v2052_v2 = vpop.f32.mrf.mxu0 }
 0x587 PF: > { %s4726_s20 = sld [smem:[#allocation41_spill]] }
 0x58d   : > { %p2057_p10 = scmp.eq.s32.totalorder %s4726_s20, 2 }
 0x58f   : > { %p2058_p12 = pnand %p2057_p10, %p1951_p0 }
 0x590   : > { %s4728_s25 = sld [smem:[#allocation70_spill]] (!%p2058_p12) }
 0x591   : > { %2061 = sbr.rel (%p2058_p12) target bundleno = 1830 (0x726), region = 140 }
 0x596   : > { %v2062_v38 = vld [vmem:[#allocation5] sm:$0xff]  ;;  %v2063_v40 = vld [vmem:[#allocation5 + $0x8] sm:$0xff]  ;;  %v2064_v42 = vld [vmem:[#allocation5 + $0x10] sm:$0xff]  ;;  %v3498_v19 = vmov 384.0   ;;  %s4729_s6 = smov %s4728_s25  ;;  %vm2156_vm2 = vcmask 7168  }
 0x597   : > { %v2065_v14 = vadd.f32 %v2063_v40, %v2062_v38  ;;  %2973 = vrcp.f32 %v3498_v19  ;;  %v2963_v61 = vld [vmem:[#allocation21] ss:$0 sm:$0xff]  ;;  %v2964_v63 = vld [vmem:[#allocation21 + $0x1] ss:$0 sm:$0xff]  ;;  %v2965_v1 = vld [vmem:[#allocation21 + $0x2] ss:$0 sm:$0xff] }
 0x598   : > { %v2966_v39 = vld [vmem:[#allocation23] ss:$0 sm:$0xff]  ;;  %v2967_v11 = vld [vmem:[#allocation23 + $0x1] ss:$0 sm:$0xff]  ;;  %v2968_v12 = vld [vmem:[#allocation23 + $0x2] ss:$0 sm:$0xff] }
 0x599   : > { %v2066_v43 = vadd.f32 %v2065_v14, %v2064_v42  ;;  %v2969_v23 = vld [vmem:[%s4728_s25] ss:$0 sm:$0xff]  ;;  %v2970_v24 = vld [vmem:[%s4729_s6 + $0x1] ss:$0 sm:$0xff]  ;;  %v2971_v27 = vld [vmem:[%s4729_s6 + $0x2] ss:$0 sm:$0xff] }
 0x59a   : > { %v2972_v22 = vld [vmem:[#allocation6] ss:$0 sm:$0xff] }
 0x59b   : > { %2067 = vadd.xlane.f32.xlu0 %v2066_v43 }
 0x59d   : > { %v2974_v55 = vpop.eup %2973 }
 0x59e   : > { %v2070_v51 = vmul.f32 384.0, %v2974_v55  ;;  %vm2074_vm14 = vweird.f32 %v2974_v55 }
 0x5a0   : > { %v2071_v16 = vsub.f32 1.0, %v2070_v51 }
 0x5a2   : > { %v2072_v8 = vmul.f32 %v2974_v55, %v2071_v16 }
 0x5a4   : > { %v2073_v48 = vadd.f32 %v2974_v55, %v2072_v8 }
 0x5a6   : > { %v2075_v49 = vsel %vm2074_vm14, %v2974_v55, %v2073_v48 }
 0x60e   : > { %v2068_v36 = vpop.xlane.xlu0 %2067 }
 0x60f   : > { %v2076_v26 = vmul.f32 %v2075_v49, %v2068_v36 }
 0x611   : > { %v2077_v52 = vsub.f32 %v2062_v38, %v2076_v26  ;;  %v2078_v53 = vsub.f32 %v2063_v40, %v2076_v26  ;;  %v2079_v54 = vsub.f32 %v2064_v42, %v2076_v26 }
 0x613   : > { %v2080_v31 = vmul.f32 %v2077_v52, %v2077_v52  ;;  %v2081_v41 = vmul.f32 %v2078_v53, %v2078_v53  ;;  %v2082_v59 = vmul.f32 %v2079_v54, %v2079_v54 }
 0x615   : > { %v2083_v13 = vadd.f32 %v2081_v41, %v2080_v31 }
 0x617   : > { %v2084_v18 = vadd.f32 %v2083_v13, %v2082_v59 }
 0x619   : > { %2085 = vadd.xlane.f32.xlu0 %v2084_v18 }
 0x68c   : > { %v2086_v47 = vpop.xlane.xlu0 %2085 }
 0x68d   : > { %v2087_v29 = vmul.f32 %v2086_v47, %v2075_v49 }
 0x68f   : > { %v2088_v56 = vadd.f32 1e-06, %v2087_v29 }
 0x691   : > { %2975 = vrsqrt.f32 %v2088_v56  ;;  %vm2095_vm0 = vweird.f32 %v2088_v56 }
 0x697   : > { %v2976_v44 = vpop.eup %2975 }
 0x698   : > { %v2090_v57 = vmul.f32 %v2976_v44, %v2088_v56  ;;  %vm2096_vm15 = vweird.f32 %v2976_v44 }
 0x699   : > { %vm2097_vm1 = vmor %vm2095_vm0, %vm2096_vm15 }
 0x69a   : > { %v2091_v58 = vmul.f32 %v2976_v44, %v2090_v57 }
 0x69c   : > { %v2092_v35 = vmul.f32 0.5, %v2091_v58 }
 0x69e   : > { %v2093_v17 = vsub.f32 1.5, %v2092_v35 }
 0x6a0   : > { %v2094_v62 = vmul.f32 %v2976_v44, %v2093_v17 }
 0x6a2   : > { %v2098_v7 = vsel %vm2097_vm1, %v2976_v44, %v2094_v62 }
 0x6a3   : > { %v2099_v5 = vmul.f32 %v2098_v7, %v2077_v52  ;;  %v2100_v28 = vmul.f32 %v2098_v7, %v2078_v53  ;;  %v2101_v9 = vmul.f32 %v2098_v7, %v2079_v54 }
 0x6a5   : > { %v2114_v10 = vmul.f32 %v2963_v61, %v2099_v5  ;;  %v2115_v0 = vmul.f32 %v2964_v63, %v2100_v28  ;;  %v2116_v15 = vmul.f32 %v2965_v1, %v2101_v9 }
 0x6a7   : > { %v2129_v25 = vadd.f32 %v2966_v39, %v2114_v10  ;;  %v2130_v21 = vadd.f32 %v2967_v11, %v2115_v0  ;;  %v2131_v50 = vadd.f32 %v2968_v12, %v2116_v15 }
 0x6a9   : > { %v2144_v30 = vmul.f32 %v2969_v23, %v2129_v25  ;;  %v2145_v6 = vmul.f32 %v2970_v24, %v2130_v21  ;;  %v2146_v20 = vmul.f32 %v2971_v27, %v2131_v50 }
 0x6ab   : > { %v2147_v46 = vadd.f32 %v2145_v6, %v2144_v30 }
 0x6ad   : > { %v2148_v60 = vadd.f32 %v2147_v46, %v2146_v20 }
 0x6af   : > { %2149 = vadd.xlane.f32.xlu1 %v2148_v60 }
 0x722   : > { %v2150_v45 = vpop.xlane.xlu1 %2149 }
 0x723   : > { %v2155_v32 = vadd.f32 %v2972_v22, %v2150_v45 }
 0x725   : > { %2157 = vst.msk [vmem:[%s4095_s19] sm:$0xff] %vm2156_vm2, %v2155_v32 }
 0x726 PF: > { %s44_s11 = sadd.s32 1, %s3485_s11   ;;  %s4731_s23 = sld [smem:[#allocation31_spill]] }
 0x727   : > { %p4496_p11 = scmp.ge.s32.totalorder %s44_s11, 14   ;;  %s4732_s24 = sld [smem:[#allocation32_spill]] }
 0x728   : > { %s4733_s25 = sld [smem:[#allocation51_spill]]  ;;  %s4745_s27 = smov %s4761_s4 }
 0x729   : > { %s4734_s26 = sld [smem:[#allocation34_spill]]  ;;  %s4746_s17 = smov %s3457_s18 }
 0x72a   : > { %s4735_s15 = sld [smem:[#allocation35_spill]]  ;;  %s4747_s18 = smov %s3871_s1 }
 0x72b   : > { %s4736_s28 = sld [smem:[#allocation36_spill]]  ;;  %s4748_s20 = smov %s3477_s14 }
 0x72c   : > { %s4737_s29 = sld [smem:[#allocation37_spill]] }
 0x72d   : > { %s4738_s30 = sld [smem:[#allocation50_spill]] }
 0x72e   : > { %s4739_s0 = sld [smem:[#allocation39_spill]] }
 0x72f   : > { %s4740_s19 = sld [smem:[#allocation43_spill]] }
 0x730   : > { %s4741_s21 = sld [smem:[#allocation44_spill]] }
 0x731   : > { %s4742_s22 = sld [smem:[#allocation46_spill]] }
 0x732   : > { %s4743_s5 = sld [smem:[#allocation47_spill]] }
 0x733   : > { %s4744_s16 = sld [smem:[#allocation48_spill]] }
 0x734   :  { %43 = sbr.rel (!%p4496_p11) target bundleno = 37 (0x25), region = 250 }
 0x738   : > { %s4749_s14 = smov %s4743_s5 }
 0x739   :  { %2177 = vsyncpa [#allocation8], 1 }
 0x73a   :  { %2179 = vsyncpa [#allocation8 + $0x1], 1 }
 0x73b   :  { %2180 = vsyncpa [#allocation10], 1 }
 0x73c   :  { %2182 = vsyncpa [#allocation10 + $0x1], 1 }
 0x73d   :  { %2183 = vsyncpa [#allocation13], 1 }
 0x73e   :  { %2185 = vsyncpa [#allocation13 + $0x1], 1 }
 0x73f   :  { %2186 = vsyncpa [#allocation16], 1 }
 0x740   :  { %2188 = vsyncpa [#allocation16 + $0x1], 1 }
 0x741   :  { %2189 = vsyncpa [#allocation19], 1 }
 0x742   :  { %2191 = vsyncpa [#allocation19 + $0x1], 1 }
 0x743   :  { %2192 = vsyncpa [#allocation22], 1 }

</bundles_post_ra>
